<compile_context>
chip_gen: v6e
topology: v6e:2x2x1
jax: 0.10.0
libtpu: 0.0.40
codegen_flags: <defaults>
</compile_context>

<pallas_src>
import functools

import jax
import jax.numpy as jnp
from jax.experimental import pallas as pl
from jax.experimental.pallas import tpu as pltpu

NSAMPLE = 4  # nsample=4 in the PyTorch module


# ----------------------------- Pallas kernel ------------------------------- #
def _gru_kernel(pcxb_ref, h_ref, idx_ref, wpxb_ref, wh_ref, wp_ref, out_ref,
                gzr_sc, gq_sc, z_sc):
    """Grid = (batch, pass, center-point tile).

    pcxb_ref : (1, 3+X+1, N)  [pc ; x ; ones] (bias carrier), full N per batch
    h_ref    : (1, H, N)      hidden state, full N per batch (aliased to out)
    idx_ref  : (1, 4, T)      int32 kNN indices for this tile's centers
    wpxb_ref : (3H, 3+X+1)    stacked [Wp | Wx | b] for gates [z ; r ; q]
    wh_ref   : (3H, H)        stacked Wh
    wp_ref   : (3H, 3)        stacked Wp (per-center subtraction term)
    out_ref  : (1, H, T)      updated hidden state for this tile
    gzr_sc   : (2H, N) bf16   z/r pre-pool features (filled once per batch)
    gq_sc    : (H, N)  bf16   q pre-pool features (columns filled in pass 0)
    z_sc     : (H, N)  f32    z gate (filled pass 0, consumed pass 1)
    """
    H = out_ref.shape[1]
    T = out_ref.shape[2]
    N = h_ref.shape[2]

    p = pl.program_id(1)                      # 0: z/r gates, 1: q gate + out
    t = pl.program_id(2)                      # center-point tile
    off = pl.multiple_of(t * T, 128)

    # Once per batch element: dense pre-pool features of the z/r gates over all
    # N candidate neighbors (two fused dots; bias rides pcxb's ones row).
    # Stored bf16: used only as MXU LHS, value rounding <= 1 bf16 ulp.
    @pl.when((p == 0) & (t == 0))
    def _():
        gzr = (jnp.dot(wpxb_ref[:2 * H], pcxb_ref[0],
                       preferred_element_type=jnp.float32)
               + jnp.dot(wh_ref[:2 * H], h_ref[0],
                         preferred_element_type=jnp.float32))        # (2H, N)
        gzr_sc[...] = gzr.astype(jnp.bfloat16)

    idx = idx_ref[0]                                   # (4, T) int32
    pcxb_t = pcxb_ref[0, :, pl.ds(off, T)]             # (3+X+1, T)
    h_t = h_ref[0, :, pl.ds(off, T)]                   # (H, T)
    pc_t = pcxb_t[:3]                                  # (3, T)

    # One-hot neighbor selection on the MXU (bf16 operands, f32 accumulation):
    # sel_j[k, i] = 1 iff idx[j, i] == k, so  g @ sel_j  gathers g[:, idx[j, i]].
    row_ids = jax.lax.broadcasted_iota(jnp.int32, (N, T), 0)

    def knn_max(g_bf16):
        pooled = None
        for j in range(NSAMPLE):
            sel = (row_ids == idx[j:j + 1]).astype(jnp.bfloat16)          # (N, T)
            cand = jnp.dot(g_bf16, sel, preferred_element_type=jnp.float32)
            pooled = cand if pooled is None else jnp.maximum(pooled, cand)
        return pooled

    # ---- pass 0: z/r gates for this tile; stage q-gate pre-pool columns ----
    @pl.when(p == 0)
    def _():
        center_zr = jnp.dot(wp_ref[:2 * H], pc_t,
                            preferred_element_type=jnp.float32)       # (2H, T)
        zr = jax.nn.sigmoid(knn_max(gzr_sc[...]) - center_zr)         # f32
        z_sc[:, pl.ds(off, T)] = zr[:H]
        r = zr[H:]
        # q-gate pre-pool features for this tile's columns: groups (r*h, x).
        gq_t = (jnp.dot(wpxb_ref[2 * H:], pcxb_t,
                        preferred_element_type=jnp.float32)
                + jnp.dot(wh_ref[2 * H:], r * h_t,
                          preferred_element_type=jnp.float32))         # (H, T)
        gq_sc[:, pl.ds(off, T)] = gq_t.astype(jnp.bfloat16)

    # ---- pass 1: q gate + GRU combine, write the output tile ----
    @pl.when(p == 1)
    def _():
        center_q = jnp.dot(wp_ref[2 * H:], pc_t,
                           preferred_element_type=jnp.float32)          # (H, T)
        q = jnp.tanh(knn_max(gq_sc[...]) - center_q)
        z = z_sc[:, pl.ds(off, T)]
        out_ref[0] = (1.0 - z) * h_t + z * q


# ------------------------------ JAX wrapper -------------------------------- #
def _vmem_limit_bytes():
    # Generation-aware scoped-VMEM budget with double-buffer headroom
    # (v7x: 64 MiB -> 48; v5e/v6e: 128 MiB -> 96).
    try:
        cap = int(pltpu.get_tpu_info().vmem_capacity_bytes)
    except Exception:
        cap = 64 << 20  # conservative fallback (assume v7x-sized VMEM)
    return int(min(96 << 20, (cap * 3) // 4))


def _pick_tile(n_pad, cap=512):
    # Largest lane-aligned tile (<= cap) dividing the padded point count.
    for c in (512, 384, 256, 128):
        if c <= cap and n_pad % c == 0:
            return c
    return 128


@functools.partial(jax.jit, donate_argnums=(0,))
def gru_forward(h, x, pc, idx, params):
    """h:[B,H,N], x:[B,X,N], pc:[B,3,N], idx:[B,N,4] int -> new h:[B,H,N]."""
    B, H, N = h.shape
    X = x.shape[1]
    assert H % 8 == 0, "hidden_dim must be a multiple of 8 (sublane tiling)"
    wz, bz, wr, br, wq, bq = params

    # Pad the point axis to a lane multiple: lane-dense output stores and
    # unmasked selection matmuls.  Padded centers are sliced off at the end;
    # padded points are never selected as neighbors (idx values < N).
    n_pad = ((N + 127) // 128) * 128
    pad = n_pad - N
    if pad:
        pc = jnp.pad(pc, ((0, 0), (0, 0), (0, pad)))
        x = jnp.pad(x, ((0, 0), (0, 0), (0, pad)))
        h = jnp.pad(h, ((0, 0), (0, 0), (0, pad)))
        idx = jnp.pad(idx, ((0, 0), (0, pad), (0, 0)))
    tile = _pick_tile(n_pad)
    n_tiles = n_pad // tile

    # Stack the three gate convs along the output channel: rows [z | r | q],
    # columns split into [xyz | hidden feats | input feats].  Bias folded as an
    # extra column matched to a ones row appended to [pc ; x].
    w_all = jnp.concatenate([wz, wr, wq], axis=0)                    # (3H, 3+H+X)
    b_all = jnp.concatenate([bz, br, bq], axis=0)                    # (3H, 1)
    wp_all = w_all[:, :3]                                            # (3H, 3)
    wh_all = w_all[:, 3:3 + H]                                       # (3H, H)
    wpxb_all = jnp.concatenate([w_all[:, :3], w_all[:, 3 + H:], b_all],
                               axis=1)                               # (3H, 3+X+1)

    pcxb = jnp.concatenate([pc, x, jnp.ones((B, 1, n_pad), pc.dtype)], axis=1)
    idx_t = jnp.transpose(idx, (0, 2, 1)).astype(jnp.int32)          # (B, 4, n_pad)

    c_in = 3 + X + 1
    full = lambda b, p, t: (b, 0, 0)
    w_map = lambda b, p, t: (0, 0)

    out = pl.pallas_call(
        _gru_kernel,
        out_shape=jax.ShapeDtypeStruct((B, H, n_pad), jnp.float32),
        grid_spec=pltpu.PrefetchScalarGridSpec(
            num_scalar_prefetch=0,
            grid=(B, 2, n_tiles),                    # batch, pass, center tile
            in_specs=[
                pl.BlockSpec((1, c_in, n_pad), full),                # [pc;x;1]
                pl.BlockSpec((1, H, n_pad), full),                   # h (aliased)
                pl.BlockSpec((1, NSAMPLE, tile), lambda b, p, t: (b, 0, t)),
                pl.BlockSpec((3 * H, c_in), w_map),                  # [Wp|Wx|b]
                pl.BlockSpec((3 * H, H), w_map),                     # Wh
                pl.BlockSpec((3 * H, 3), w_map),                     # Wp
            ],
            # The output block index ignores the tile during pass 0, so the
            # never-written buffer is not flushed; each tile is written exactly
            # once (pass 1) and flushed with correct data.
            out_specs=pl.BlockSpec((1, H, tile), lambda b, p, t: (b, 0, t * p)),
            scratch_shapes=[
                pltpu.VMEM((2 * H, n_pad), jnp.bfloat16),   # gzr (z/r pre-pool)
                pltpu.VMEM((H, n_pad), jnp.bfloat16),       # gq  (q pre-pool)
                pltpu.VMEM((H, n_pad), jnp.float32),        # z gate
            ],
        ),
        # In-place GRU update of the hidden state (real with jit donation).
        input_output_aliases={1: 0},
        compiler_params=pltpu.CompilerParams(
            dimension_semantics=("parallel", "arbitrary", "arbitrary"),
            vmem_limit_bytes=_vmem_limit_bytes(),
        ),
    )(pcxb, h, idx_t, wpxb_all, wh_all, wp_all)

    return out[..., :N] if pad else out


def knn_indices(pc, k=NSAMPLE):
    """kNN index selection (glue, plain JAX).  pc: [B, 3, N] -> idx [B, N, k]."""
    xyz = jnp.transpose(pc, (0, 2, 1))                                     # [B,N,3]
    d2 = jnp.sum((xyz[:, :, None, :] - xyz[:, None, :, :]) ** 2, axis=-1)  # [B,N,N]
    _, idx = jax.lax.top_k(-d2, k)                                         # [B,N,k]
    return idx


# ------------------------ pure-JAX reference (check) ------------------------ #
def _sa_ref(w, b, pc_b, feat_b, idx_b):
    rel = pc_b[:, idx_b] - pc_b[:, :, None]            # [3, N, k]
    gf = feat_b[:, idx_b]                              # [C, N, k]
    grouped = jnp.concatenate([rel, gf], axis=0)       # [3+C, N, k]
    pre = jnp.einsum('oc,cnk->onk', w, grouped) + b[:, :, None]
    return jnp.max(pre, axis=-1)                       # [H, N]


def gru_ref(h, x, pc, idx, params):
    wz, bz, wr, br, wq, bq = params
    outs = []
    for b in range(pc.shape[0]):
        hx = jnp.concatenate([h[b], x[b]], axis=0)
        z = jax.nn.sigmoid(_sa_ref(wz, bz, pc[b], hx, idx[b]))
        r = jax.nn.sigmoid(_sa_ref(wr, br, pc[b], hx, idx[b]))
        rhx = jnp.concatenate([r * h[b], x[b]], axis=0)
        q = jnp.tanh(_sa_ref(wq, bq, pc[b], rhx, idx[b]))
        outs.append((1.0 - z) * h[b] + z * q)
    return jnp.stack(outs)


# --------------------------------- main ------------------------------------ #
def init_params(key, hid, xdim):
    C = 3 + hid + xdim
    ks = jax.random.split(key, 6)
    s = 1.0 / (C ** 0.5)
    w = lambda k: jax.random.uniform(k, (hid, C), jnp.float32, -s, s)
    b = lambda k: jax.random.uniform(k, (hid, 1), jnp.float32, -s, s)
    return (w(ks[0]), b(ks[1]), w(ks[2]), b(ks[3]), w(ks[4]), b(ks[5]))


if __name__ == "__main__":
    key = jax.random.PRNGKey(0)
    B, N, hidden_dim, input_dim = 2, 128, 32, 16   # GRU(npoint=8*N, hidden, input)
    k_pc, k_h, k_x, k_p = jax.random.split(key, 4)

    pc = jax.random.normal(k_pc, (B, 3, N), jnp.float32)
    h = 0.5 * jax.random.normal(k_h, (B, hidden_dim, N), jnp.float32)
    x = 0.5 * jax.random.normal(k_x, (B, input_dim, N), jnp.float32)
    params = init_params(k_p, hidden_dim, input_dim)

    idx = knn_indices(pc)                       # [B, N, 4]

    # Reference first (the kernel donates / updates the h buffer in place).
    ref = jax.block_until_ready(gru_ref(h, x, pc, idx, params))

    out = gru_forward(h, x, pc, idx, params)    # h donated here
    out = jax.block_until_ready(out)

    err = float(jnp.max(jnp.abs(out - ref)))
    assert out.shape == (B, hidden_dim, N)
    assert err < 2e-2, f"max abs err {err}"
    print("KERNEL_OK")
</pallas_src>

<mosaic_0001>
module attributes {stable_mosaic.version = 11 : i64} {
  func.func @_gru_kernel(%arg0: i32, %arg1: i32, %arg2: i32, %arg3: memref<1x20x128xf32, #tpu.memory_space<vmem>>, %arg4: memref<1x32x128xf32, #tpu.memory_space<vmem>>, %arg5: memref<1x4x128xi32, #tpu.memory_space<vmem>>, %arg6: memref<96x20xf32, #tpu.memory_space<vmem>>, %arg7: memref<96x32xf32, #tpu.memory_space<vmem>>, %arg8: memref<96x3xf32, #tpu.memory_space<vmem>>, %arg9: memref<1x32x128xf32, #tpu.memory_space<vmem>>, %arg10: memref<64x128xbf16, #tpu.memory_space<vmem>>, %arg11: memref<32x128xbf16, #tpu.memory_space<vmem>>, %arg12: memref<32x128xf32, #tpu.memory_space<vmem>>) attributes {dimension_semantics = [#tpu.dimension_semantics<parallel>, #tpu.dimension_semantics<arbitrary>, #tpu.dimension_semantics<arbitrary>], iteration_bounds = array<i64: 2, 2, 1>, scalar_prefetch = 0 : i64, scratch_operands = 3 : i64, tpu.core_type = #tpu.core_type<tc>, window_params = [{transform_indices = @transform_0, window_bounds = array<i64: 1, 20, 128>}, {transform_indices = @transform_1, window_bounds = array<i64: 1, 32, 128>}, {transform_indices = @transform_2, window_bounds = array<i64: 1, 4, 128>}, {pipeline_mode = #tpu.pipeline_mode<synchronous>, transform_indices = @transform_3, window_bounds = array<i64: 96, 20>}, {pipeline_mode = #tpu.pipeline_mode<synchronous>, transform_indices = @transform_4, window_bounds = array<i64: 96, 32>}, {pipeline_mode = #tpu.pipeline_mode<synchronous>, transform_indices = @transform_5, window_bounds = array<i64: 96, 3>}, {transform_indices = @transform_6, window_bounds = array<i64: 1, 32, 128>}]} {
    %c128_i32 = arith.constant 128 : i32
    %0 = arith.muli %arg2, %c128_i32 : i32
    %1 = tpu.assume_multiple %0, 128 : i32
    %c0_i32 = arith.constant 0 : i32
    %2 = arith.cmpi eq, %arg1, %c0_i32 : i32
    %c0_i32_0 = arith.constant 0 : i32
    %3 = arith.cmpi eq, %arg2, %c0_i32_0 : i32
    %4 = arith.andi %2, %3 : i1
    %5 = arith.extui %4 : i1 to i32
    %c0_i32_1 = arith.constant 0 : i32
    %6 = arith.cmpi ne, %5, %c0_i32_1 : i32
    scf.if %6 {
      %c0_11 = arith.constant 0 : index
      %c0_12 = arith.constant 0 : index
      %23 = vector.load %arg6[%c0_11, %c0_12] : memref<96x20xf32, #tpu.memory_space<vmem>>, vector<64x20xf32>
      %c0_13 = arith.constant 0 : index
      %c0_14 = arith.constant 0 : index
      %c0_15 = arith.constant 0 : index
      %24 = vector.load %arg3[%c0_13, %c0_14, %c0_15] : memref<1x20x128xf32, #tpu.memory_space<vmem>>, vector<1x20x128xf32>
      %25 = vector.shape_cast %24 : vector<1x20x128xf32> to vector<20x128xf32>
      %cst = arith.constant dense<0.000000e+00> : vector<64x128xf32>
      %26 = tpu.matmul %23, %25, %cst {dimension_numbers = #tpu.dot_dimension_numbers<[1], [0], [0], [1], [0, 0, 1, 1], [], []>} : vector<64x20xf32>, vector<20x128xf32>, vector<64x128xf32> -> vector<64x128xf32>
      %c0_16 = arith.constant 0 : index
      %c0_17 = arith.constant 0 : index
      %27 = vector.load %arg7[%c0_16, %c0_17] : memref<96x32xf32, #tpu.memory_space<vmem>>, vector<64x32xf32>
      %c0_18 = arith.constant 0 : index
      %c0_19 = arith.constant 0 : index
      %c0_20 = arith.constant 0 : index
      %28 = vector.load %arg4[%c0_18, %c0_19, %c0_20] : memref<1x32x128xf32, #tpu.memory_space<vmem>>, vector<1x32x128xf32>
      %29 = vector.shape_cast %28 : vector<1x32x128xf32> to vector<32x128xf32>
      %cst_21 = arith.constant dense<0.000000e+00> : vector<64x128xf32>
      %30 = tpu.matmul %27, %29, %cst_21 {dimension_numbers = #tpu.dot_dimension_numbers<[1], [0], [0], [1], [0, 0, 1, 1], [], []>} : vector<64x32xf32>, vector<32x128xf32>, vector<64x128xf32> -> vector<64x128xf32>
      %31 = arith.addf %26, %30 : vector<64x128xf32>
      %32 = arith.truncf %31 : vector<64x128xf32> to vector<64x128xbf16>
      %c0_22 = arith.constant 0 : index
      %c0_23 = arith.constant 0 : index
      %33 = vector.load %arg10[%c0_22, %c0_23] : memref<64x128xbf16, #tpu.memory_space<vmem>>, vector<64x128xbf16>
      tpu.vector_store %arg10[%c0_22, %c0_23], %32 {strides = array<i32>} : memref<64x128xbf16, #tpu.memory_space<vmem>>, vector<64x128xbf16>,
    } else {
    }
    %c0 = arith.constant 0 : index
    %c0_2 = arith.constant 0 : index
    %c0_3 = arith.constant 0 : index
    %7 = vector.load %arg5[%c0, %c0_2, %c0_3] : memref<1x4x128xi32, #tpu.memory_space<vmem>>, vector<1x4x128xi32>
    %8 = vector.shape_cast %7 : vector<1x4x128xi32> to vector<4x128xi32>
    %c0_4 = arith.constant 0 : index
    %c0_5 = arith.constant 0 : index
    %9 = arith.index_cast %1 : i32 to index
    %10 = vector.load %arg3[%c0_4, %c0_5, %9] : memref<1x20x128xf32, #tpu.memory_space<vmem>>, vector<1x20x128xf32>
    %11 = vector.shape_cast %10 : vector<1x20x128xf32> to vector<20x128xf32>
    %c0_6 = arith.constant 0 : index
    %c0_7 = arith.constant 0 : index
    %12 = arith.index_cast %1 : i32 to index
    %13 = vector.load %arg4[%c0_6, %c0_7, %12] : memref<1x32x128xf32, #tpu.memory_space<vmem>>, vector<1x32x128xf32>
    %14 = vector.shape_cast %13 : vector<1x32x128xf32> to vector<32x128xf32>
    %15 = vector.extract_strided_slice %11 {offsets = [0, 0], sizes = [3, 128], strides = [1, 1]} : vector<20x128xf32> to vector<3x128xf32>
    %16 = tpu.iota {dimensions = array<i32: 0>} : vector<128x128xi32>
    %c0_i32_8 = arith.constant 0 : i32
    %17 = arith.cmpi eq, %arg1, %c0_i32_8 : i32
    %18 = arith.extui %17 : i1 to i32
    %c0_i32_9 = arith.constant 0 : i32
    %19 = arith.cmpi ne, %18, %c0_i32_9 : i32
    scf.if %19 {
      %c0_11 = arith.constant 0 : index
      %c0_12 = arith.constant 0 : index
      %23 = vector.load %arg8[%c0_11, %c0_12] : memref<96x3xf32, #tpu.memory_space<vmem>>, vector<64x3xf32>
      %cst = arith.constant dense<0.000000e+00> : vector<64x128xf32>
      %24 = tpu.matmul %23, %15, %cst {dimension_numbers = #tpu.dot_dimension_numbers<[1], [0], [0], [1], [0, 0, 1, 1], [], []>} : vector<64x3xf32>, vector<3x128xf32>, vector<64x128xf32> -> vector<64x128xf32>
      %c0_13 = arith.constant 0 : index
      %c0_14 = arith.constant 0 : index
      %25 = vector.load %arg10[%c0_13, %c0_14] : memref<64x128xbf16, #tpu.memory_space<vmem>>, vector<64x128xbf16>
      %26 = vector.extract_strided_slice %8 {offsets = [0, 0], sizes = [1, 128], strides = [1, 1]} : vector<4x128xi32> to vector<1x128xi32>
      %27 = vector.broadcast %26 : vector<1x128xi32> to vector<128x128xi32>
      %28 = arith.cmpi eq, %16, %27 : vector<128x128xi32>
      %29 = arith.extui %28 : vector<128x128xi1> to vector<128x128xi32>
      %30 = arith.sitofp %29 : vector<128x128xi32> to vector<128x128xf32>
      %31 = arith.truncf %30 : vector<128x128xf32> to vector<128x128xbf16>
      %cst_15 = arith.constant dense<0.000000e+00> : vector<64x128xf32>
      %32 = tpu.matmul %25, %31, %cst_15 {dimension_numbers = #tpu.dot_dimension_numbers<[1], [0], [0], [1], [0, 0, 1, 1], [], []>} : vector<64x128xbf16>, vector<128x128xbf16>, vector<64x128xf32> -> vector<64x128xf32>
      %33 = vector.extract_strided_slice %8 {offsets = [1, 0], sizes = [1, 128], strides = [1, 1]} : vector<4x128xi32> to vector<1x128xi32>
      %34 = vector.broadcast %33 : vector<1x128xi32> to vector<128x128xi32>
      %35 = arith.cmpi eq, %16, %34 : vector<128x128xi32>
      %36 = arith.extui %35 : vector<128x128xi1> to vector<128x128xi32>
      %37 = arith.sitofp %36 : vector<128x128xi32> to vector<128x128xf32>
      %38 = arith.truncf %37 : vector<128x128xf32> to vector<128x128xbf16>
      %cst_16 = arith.constant dense<0.000000e+00> : vector<64x128xf32>
      %39 = tpu.matmul %25, %38, %cst_16 {dimension_numbers = #tpu.dot_dimension_numbers<[1], [0], [0], [1], [0, 0, 1, 1], [], []>} : vector<64x128xbf16>, vector<128x128xbf16>, vector<64x128xf32> -> vector<64x128xf32>
      %40 = arith.maximumf %32, %39 : vector<64x128xf32>
      %41 = vector.extract_strided_slice %8 {offsets = [2, 0], sizes = [1, 128], strides = [1, 1]} : vector<4x128xi32> to vector<1x128xi32>
      %42 = vector.broadcast %41 : vector<1x128xi32> to vector<128x128xi32>
      %43 = arith.cmpi eq, %16, %42 : vector<128x128xi32>
      %44 = arith.extui %43 : vector<128x128xi1> to vector<128x128xi32>
      %45 = arith.sitofp %44 : vector<128x128xi32> to vector<128x128xf32>
      %46 = arith.truncf %45 : vector<128x128xf32> to vector<128x128xbf16>
      %cst_17 = arith.constant dense<0.000000e+00> : vector<64x128xf32>
      %47 = tpu.matmul %25, %46, %cst_17 {dimension_numbers = #tpu.dot_dimension_numbers<[1], [0], [0], [1], [0, 0, 1, 1], [], []>} : vector<64x128xbf16>, vector<128x128xbf16>, vector<64x128xf32> -> vector<64x128xf32>
      %48 = arith.maximumf %40, %47 : vector<64x128xf32>
      %49 = vector.extract_strided_slice %8 {offsets = [3, 0], sizes = [1, 128], strides = [1, 1]} : vector<4x128xi32> to vector<1x128xi32>
      %50 = vector.broadcast %49 : vector<1x128xi32> to vector<128x128xi32>
      %51 = arith.cmpi eq, %16, %50 : vector<128x128xi32>
      %52 = arith.extui %51 : vector<128x128xi1> to vector<128x128xi32>
      %53 = arith.sitofp %52 : vector<128x128xi32> to vector<128x128xf32>
      %54 = arith.truncf %53 : vector<128x128xf32> to vector<128x128xbf16>
      %cst_18 = arith.constant dense<0.000000e+00> : vector<64x128xf32>
      %55 = tpu.matmul %25, %54, %cst_18 {dimension_numbers = #tpu.dot_dimension_numbers<[1], [0], [0], [1], [0, 0, 1, 1], [], []>} : vector<64x128xbf16>, vector<128x128xbf16>, vector<64x128xf32> -> vector<64x128xf32>
      %56 = arith.maximumf %48, %55 : vector<64x128xf32>
      %57 = arith.subf %56, %24 : vector<64x128xf32>
      %58 = arith.negf %57 : vector<64x128xf32>
      %59 = math.exp %58 : vector<64x128xf32>
      %cst_19 = arith.constant 1.000000e+00 : f32
      %60 = vector.broadcast %cst_19 : f32 to vector<64x128xf32>
      %61 = arith.addf %60, %59 : vector<64x128xf32>
      %62 = arith.divf %60, %61 : vector<64x128xf32>
      %63 = vector.extract_strided_slice %62 {offsets = [0, 0], sizes = [32, 128], strides = [1, 1]} : vector<64x128xf32> to vector<32x128xf32>
      %c0_20 = arith.constant 0 : index
      %64 = arith.index_cast %1 : i32 to index
      %65 = vector.load %arg12[%c0_20, %64] : memref<32x128xf32, #tpu.memory_space<vmem>>, vector<32x128xf32>
      tpu.vector_store %arg12[%c0_20, %64], %63 {strides = array<i32>} : memref<32x128xf32, #tpu.memory_space<vmem>>, vector<32x128xf32>,
      %66 = vector.extract_strided_slice %62 {offsets = [32, 0], sizes = [32, 128], strides = [1, 1]} : vector<64x128xf32> to vector<32x128xf32>
      %c64 = arith.constant 64 : index
      %c0_21 = arith.constant 0 : index
      %67 = vector.load %arg6[%c64, %c0_21] : memref<96x20xf32, #tpu.memory_space<vmem>>, vector<32x20xf32>
      %cst_22 = arith.constant dense<0.000000e+00> : vector<32x128xf32>
      %68 = tpu.matmul %67, %11, %cst_22 {dimension_numbers = #tpu.dot_dimension_numbers<[1], [0], [0], [1], [0, 0, 1, 1], [], []>} : vector<32x20xf32>, vector<20x128xf32>, vector<32x128xf32> -> vector<32x128xf32>
      %c64_23 = arith.constant 64 : index
      %c0_24 = arith.constant 0 : index
      %69 = vector.load %arg7[%c64_23, %c0_24] : memref<96x32xf32, #tpu.memory_space<vmem>>, vector<32x32xf32>
      %70 = arith.mulf %66, %14 : vector<32x128xf32>
      %cst_25 = arith.constant dense<0.000000e+00> : vector<32x128xf32>
      %71 = tpu.matmul %69, %70, %cst_25 {dimension_numbers = #tpu.dot_dimension_numbers<[1], [0], [0], [1], [0, 0, 1, 1], [], []>} : vector<32x32xf32>, vector<32x128xf32>, vector<32x128xf32> -> vector<32x128xf32>
      %72 = arith.addf %68, %71 : vector<32x128xf32>
      %73 = arith.truncf %72 : vector<32x128xf32> to vector<32x128xbf16>
      %c0_26 = arith.constant 0 : index
      %74 = arith.index_cast %1 : i32 to index
      %75 = vector.load %arg11[%c0_26, %74] : memref<32x128xbf16, #tpu.memory_space<vmem>>, vector<32x128xbf16>
      tpu.vector_store %arg11[%c0_26, %74], %73 {strides = array<i32>} : memref<32x128xbf16, #tpu.memory_space<vmem>>, vector<32x128xbf16>,
    } else {
    }
    %c1_i32 = arith.constant 1 : i32
    %20 = arith.cmpi eq, %arg1, %c1_i32 : i32
    %21 = arith.extui %20 : i1 to i32
    %c0_i32_10 = arith.constant 0 : i32
    %22 = arith.cmpi ne, %21, %c0_i32_10 : i32
    scf.if %22 {
      %c64 = arith.constant 64 : index
      %c0_11 = arith.constant 0 : index
      %23 = vector.load %arg8[%c64, %c0_11] : memref<96x3xf32, #tpu.memory_space<vmem>>, vector<32x3xf32>
      %cst = arith.constant dense<0.000000e+00> : vector<32x128xf32>
      %24 = tpu.matmul %23, %15, %cst {dimension_numbers = #tpu.dot_dimension_numbers<[1], [0], [0], [1], [0, 0, 1, 1], [], []>} : vector<32x3xf32>, vector<3x128xf32>, vector<32x128xf32> -> vector<32x128xf32>
      %c0_12 = arith.constant 0 : index
      %c0_13 = arith.constant 0 : index
      %25 = vector.load %arg11[%c0_12, %c0_13] : memref<32x128xbf16, #tpu.memory_space<vmem>>, vector<32x128xbf16>
      %26 = vector.extract_strided_slice %8 {offsets = [0, 0], sizes = [1, 128], strides = [1, 1]} : vector<4x128xi32> to vector<1x128xi32>
      %27 = vector.broadcast %26 : vector<1x128xi32> to vector<128x128xi32>
      %28 = arith.cmpi eq, %16, %27 : vector<128x128xi32>
      %29 = arith.extui %28 : vector<128x128xi1> to vector<128x128xi32>
      %30 = arith.sitofp %29 : vector<128x128xi32> to vector<128x128xf32>
      %31 = arith.truncf %30 : vector<128x128xf32> to vector<128x128xbf16>
      %cst_14 = arith.constant dense<0.000000e+00> : vector<32x128xf32>
      %32 = tpu.matmul %25, %31, %cst_14 {dimension_numbers = #tpu.dot_dimension_numbers<[1], [0], [0], [1], [0, 0, 1, 1], [], []>} : vector<32x128xbf16>, vector<128x128xbf16>, vector<32x128xf32> -> vector<32x128xf32>
      %33 = vector.extract_strided_slice %8 {offsets = [1, 0], sizes = [1, 128], strides = [1, 1]} : vector<4x128xi32> to vector<1x128xi32>
      %34 = vector.broadcast %33 : vector<1x128xi32> to vector<128x128xi32>
      %35 = arith.cmpi eq, %16, %34 : vector<128x128xi32>
      %36 = arith.extui %35 : vector<128x128xi1> to vector<128x128xi32>
      %37 = arith.sitofp %36 : vector<128x128xi32> to vector<128x128xf32>
      %38 = arith.truncf %37 : vector<128x128xf32> to vector<128x128xbf16>
      %cst_15 = arith.constant dense<0.000000e+00> : vector<32x128xf32>
      %39 = tpu.matmul %25, %38, %cst_15 {dimension_numbers = #tpu.dot_dimension_numbers<[1], [0], [0], [1], [0, 0, 1, 1], [], []>} : vector<32x128xbf16>, vector<128x128xbf16>, vector<32x128xf32> -> vector<32x128xf32>
      %40 = arith.maximumf %32, %39 : vector<32x128xf32>
      %41 = vector.extract_strided_slice %8 {offsets = [2, 0], sizes = [1, 128], strides = [1, 1]} : vector<4x128xi32> to vector<1x128xi32>
      %42 = vector.broadcast %41 : vector<1x128xi32> to vector<128x128xi32>
      %43 = arith.cmpi eq, %16, %42 : vector<128x128xi32>
      %44 = arith.extui %43 : vector<128x128xi1> to vector<128x128xi32>
      %45 = arith.sitofp %44 : vector<128x128xi32> to vector<128x128xf32>
      %46 = arith.truncf %45 : vector<128x128xf32> to vector<128x128xbf16>
      %cst_16 = arith.constant dense<0.000000e+00> : vector<32x128xf32>
      %47 = tpu.matmul %25, %46, %cst_16 {dimension_numbers = #tpu.dot_dimension_numbers<[1], [0], [0], [1], [0, 0, 1, 1], [], []>} : vector<32x128xbf16>, vector<128x128xbf16>, vector<32x128xf32> -> vector<32x128xf32>
      %48 = arith.maximumf %40, %47 : vector<32x128xf32>
      %49 = vector.extract_strided_slice %8 {offsets = [3, 0], sizes = [1, 128], strides = [1, 1]} : vector<4x128xi32> to vector<1x128xi32>
      %50 = vector.broadcast %49 : vector<1x128xi32> to vector<128x128xi32>
      %51 = arith.cmpi eq, %16, %50 : vector<128x128xi32>
      %52 = arith.extui %51 : vector<128x128xi1> to vector<128x128xi32>
      %53 = arith.sitofp %52 : vector<128x128xi32> to vector<128x128xf32>
      %54 = arith.truncf %53 : vector<128x128xf32> to vector<128x128xbf16>
      %cst_17 = arith.constant dense<0.000000e+00> : vector<32x128xf32>
      %55 = tpu.matmul %25, %54, %cst_17 {dimension_numbers = #tpu.dot_dimension_numbers<[1], [0], [0], [1], [0, 0, 1, 1], [], []>} : vector<32x128xbf16>, vector<128x128xbf16>, vector<32x128xf32> -> vector<32x128xf32>
      %56 = arith.maximumf %48, %55 : vector<32x128xf32>
      %57 = arith.subf %56, %24 : vector<32x128xf32>
      %58 = math.tanh %57 : vector<32x128xf32>
      %c0_18 = arith.constant 0 : index
      %59 = arith.index_cast %1 : i32 to index
      %60 = vector.load %arg12[%c0_18, %59] : memref<32x128xf32, #tpu.memory_space<vmem>>, vector<32x128xf32>
      %cst_19 = arith.constant 1.000000e+00 : f32
      %61 = vector.broadcast %cst_19 : f32 to vector<32x128xf32>
      %62 = arith.subf %61, %60 : vector<32x128xf32>
      %63 = arith.mulf %62, %14 : vector<32x128xf32>
      %64 = arith.mulf %60, %58 : vector<32x128xf32>
      %65 = arith.addf %63, %64 : vector<32x128xf32>
      %c0_20 = arith.constant 0 : index
      %c0_21 = arith.constant 0 : index
      %c0_22 = arith.constant 0 : index
      %66 = vector.load %arg9[%c0_20, %c0_21, %c0_22] : memref<1x32x128xf32, #tpu.memory_space<vmem>>, vector<1x32x128xf32>
      %67 = vector.shape_cast %66 : vector<1x32x128xf32> to vector<32x128xf32>
      %68 = vector.shape_cast %65 : vector<32x128xf32> to vector<1x32x128xf32>
      tpu.vector_store %arg9[%c0_20, %c0_21, %c0_22], %68 {strides = array<i32>} : memref<1x32x128xf32, #tpu.memory_space<vmem>>, vector<1x32x128xf32>,
    } else {
    }
    return
  }
  func.func @transform_0(%arg0: i32, %arg1: i32, %arg2: i32) -> (i32, i32, i32) {
    %c0_i32 = arith.constant 0 : i32
    %c0_i32_0 = arith.constant 0 : i32
    %c0_i32_1 = arith.constant 0 : i32
    return %arg0, %c0_i32, %c0_i32_0 : i32, i32, i32
  }
  func.func @transform_1(%arg0: i32, %arg1: i32, %arg2: i32) -> (i32, i32, i32) {
    %c0_i32 = arith.constant 0 : i32
    %c0_i32_0 = arith.constant 0 : i32
    %c0_i32_1 = arith.constant 0 : i32
    return %arg0, %c0_i32, %c0_i32_0 : i32, i32, i32
  }
  func.func @transform_2(%arg0: i32, %arg1: i32, %arg2: i32) -> (i32, i32, i32) {
    %c0_i32 = arith.constant 0 : i32
    %c0_i32_0 = arith.constant 0 : i32
    return %arg0, %c0_i32, %arg2 : i32, i32, i32
  }
  func.func @transform_3(%arg0: i32, %arg1: i32, %arg2: i32) -> (i32, i32) {
    %c0_i32 = arith.constant 0 : i32
    %c0_i32_0 = arith.constant 0 : i32
    %c0_i32_1 = arith.constant 0 : i32
    return %c0_i32, %c0_i32_0 : i32, i32
  }
  func.func @transform_4(%arg0: i32, %arg1: i32, %arg2: i32) -> (i32, i32) {
    %c0_i32 = arith.constant 0 : i32
    %c0_i32_0 = arith.constant 0 : i32
    %c0_i32_1 = arith.constant 0 : i32
    return %c0_i32, %c0_i32_0 : i32, i32
  }
  func.func @transform_5(%arg0: i32, %arg1: i32, %arg2: i32) -> (i32, i32) {
    %c0_i32 = arith.constant 0 : i32
    %c0_i32_0 = arith.constant 0 : i32
    %c0_i32_1 = arith.constant 0 : i32
    return %c0_i32, %c0_i32_0 : i32, i32
  }
  func.func @transform_6(%arg0: i32, %arg1: i32, %arg2: i32) -> (i32, i32, i32) {
    %0 = arith.muli %arg2, %arg1 : i32
    %c0_i32 = arith.constant 0 : i32
    %c0_i32_0 = arith.constant 0 : i32
    return %arg0, %c0_i32, %0 : i32, i32, i32
  }
}

</mosaic_0001>

<bundles_post_ra>
// kernel: gru_forward.1
= control target key start
LH: loop header
LB: loop body
LE: loop exit
PB: predicated region body
PF: predicated region fallthrough
CT: control target
= control target key end

     0   :  { %11 = vsyncpa [#allocation6], 0  ;;  %s4772_s0 = inlined_call_operand.vmem [shape: f32[2,20,128], index: 0, kind: input, shape index: {}]   ;;  %s4773_s1 = inlined_call_operand.hbm [shape: f32[2,32,128], index: 1, kind: input, shape index: {}, may-alias: {1,6}]   ;;  %s4774_s2 = inlined_call_operand.vmem [shape: s32[2,4,128], index: 2, kind: input, shape index: {}]   ;;  %s4775_s3 = inlined_call_operand.vmem [shape: f32[96,20], index: 3, kind: input, shape index: {}]   ;;  %s4776_s4 = inlined_call_operand.vmem [shape: f32[96,32], index: 4, kind: input, shape index: {}]   ;;  %s4777_s5 = inlined_call_operand.vmem [shape: f32[96,3], index: 5, kind: input, shape index: {}]   ;;  %s4778_s6 = inlined_call_operand.hbm [shape: f32[2,32,128], index: 6, kind: output, shape index: {}, may-alias: {1,6}]  }
   0x1   :  { %13 = vsyncpa [#allocation6 + $0x1], 0 }
   0x2   :  { %14 = vsyncpa [#allocation7], 0 }
   0x3   :  { %16 = vsyncpa [#allocation7 + $0x1], 0  ;;  %s3540_s21 = smov 0   ;;  %s3542_s22 = smov 0  }
   0x4   :  { %s3544_s23 = smov 0   ;;  %s3546_s24 = smov 0  }
   0x5   :  { %s3548_s25 = smov 0   ;;  %s3550_s26 = smov 0  }
   0x6   :  { %s3552_s27 = smov 0   ;;  %s3554_s28 = smov 0  }
   0x7 LB: > { %4785 = sst [smem:[#allocation11_spill]] %s3491_s27  ;;  %s2447_s29 = sadd.s32 4294967295, %s3495_s28   ;;  %s3495_s28 = sphi %s3554_s28, %s22_s28   ;;  %s3491_s27 = sphi %s3552_s27, %s4879_s27   ;;  %s3487_s26 = sphi %s3550_s26, %s4884_s26   ;;  %s3483_s25 = sphi %s3548_s25, %s4877_s25   ;;  %s3479_s24 = sphi %s3546_s24, %s4883_s24   ;;  %s3475_s23 = sphi %s3544_s23, %s4882_s23   ;;  %s3471_s22 = sphi %s3542_s22, %s4881_s22   ;;  %s3467_s21 = sphi %s3540_s21, %s4880_s21  }
   0x8   : > { %s2448_s30 = sadd.s32 4294967294, %s3495_s28   ;;  %s37_s7 = sadd.s32 1, %s3487_s26 }
   0x9   : > { %s41_s8 = sadd.s32 1, %s3491_s27  ;;  %p39_p0 = scmp.ge.s32.totalorder %s37_s7, 2 }
   0xa   : > { %s74_s9 = sadd.s32 1, %s3475_s23  ;;  %p81_p1 = scmp.ne.s32.totalorder %s3475_s23, %s3471_s22 }
   0xb   : > { %p82_p2 = scmp.eq.s32.totalorder %s3495_s28, 0  ;;  %s4886_s7 = smov (%p39_p0, %s37_s7), 0 }
   0xc   : > { %4786 = sst [smem:[#allocation12_spill]] %s4886_s7  ;;  %s4888_s8 = smov (!%p39_p0, %s41_s8), %s3491_s27 }
   0xd   : > { %p3591_p3 = por %p82_p2, %p81_p1  ;;  %p87_p4 = scmp.ne.s32.totalorder %s3471_s22, %s3467_s21 }
   0xe   : > { %p43_p5 = scmp.ge.s32.totalorder %s4888_s8, 2  ;;  %p88_p6 = scmp.eq.s32.totalorder %s2447_s29, 0 }
   0xf   : > { %p206_p7 = scmp.eq.s32.totalorder %s2447_s29, 3  ;;  %p212_p8 = scmp.eq.s32.totalorder %s2448_s30, 3 }
  0x10   : > { %s4890_s8 = smov (%p43_p5, %s4888_s8), 0  ;;  %p3599_p9 = por %p88_p6, %p87_p4 }
  0x11   : > { %4788 = sst [smem:[#allocation13_spill]] %s4890_s8  ;;  %p3603_p10 = por %p206_p7, %p81_p1 }
  0x12   : > { %s71_s13 = ssub.s32 %s3491_s27, %s4890_s8  ;;  %p3609_p11 = por %p212_p8, %p87_p4 }
  0x13   : > { %p72_p12 = scmp.eq.s32.totalorder %s71_s13, 0  ;;  %p3253_p13 = scmp.lt.s32.totalorder %s3495_s28, 4 }
  0x14   : > { %s249_s15 = sand.u32 1, %s3475_s23   ;;  %s2789_s18 = sshll.u32 %s3491_s27, 9 }
  0x15   : > { %s3616_s16 = scalar_select %p72_p12, %s3475_s23, %s74_s9  }
  0x16   : > { %s2451_s17 = sshll.u32 %s249_s15, 5  ;;  %s259_s29 = scalar_lea.hbm %s4773_s1, %s2789_s18 }
  0x17   : > { %s253_s30 = scalar_lea.vmem [#allocation5], %s2451_s17  ;;  %p3624_p0 = pnand %p3253_p13, %p3591_p3 }
  0x18   : > { %s260_s7 = sshll.u32 %s253_s30, 4  ;;  %p2454_p1 = scmp.ge.s32.totalorder %s3495_s28, 1  ;;  %s261_s7 = int_to_ptr.vmem [resolvable:$true] %s260_s7 }
  0x19   : > { %s250_s13 = scalar_lea.sflag [#allocation6], %s249_s15  ;;  %p3373_p2 = pneg %p3624_p0 }
  0x1a   : > { %s3384_s9 = scalar_lea.vmem %s261_s7, 512  ;;  %s3497_s27 = smov [#allocation5]  }
  0x1b   : > { %p3385_p4 = scmp.ne.s32.totalorder %s261_s7, %s3384_s9  ;;  %s3389_s19 = sshll.u32 %s3497_s27, 4  ;;  %s3390_s19 = int_to_ptr.vmem [resolvable:$false] %s3389_s19 }
  0x1c   : > { %s3391_s17 = scalar_lea.vmem %s3390_s19, 1024  ;;  %p3392_p7 = scmp.lt.s32.totalorder %s261_s7, %s3390_s19 }
  0x1d   : > { %p3387_p5 = pnand %p3385_p4, %p3373_p2  ;;  %p3393_p8 = scmp.lt.s32.totalorder %s3391_s17, %s3384_s9 }
  0x1f   : > { %p3388_p6 = pneg %p3387_p5  ;;  %p3394_p12 = por %p3393_p8, %p3392_p7 }
  0x21   : > { %p3395_p3 = pnand %p3394_p12, %p3388_p6 }
  0x23   : > { %3398 = shalt.err (!%p3395_p3)
}
  0x24   : > { %s3498_s10 = smov 128   ;;  %s3499_s15 = smov 8  }
  0x25   : > { %3248 = dma.hbm_to_vmem [thread:$0]  (!%p3624_p0), %s259_s29, 512, %s261_s7, %s250_s13, %s3498_s10, %s3498_s10, %s3499_s15  }
  0x26   : > { %p278_p13 = scmp.lt.s32.totalorder %s3495_s28, 5 }
  0x28   : > { %p279_p2 = pnand %p2454_p1, %p278_p13 }
  0x2a   : > { %282 = sbr.rel (%p279_p2) target bundleno = 1137 (0x471), region = 44 }
  0x2f   : > { %s3637_s27 = sand.u32 1, %s3471_s22  }
  0x30   : > { %s2455_s18 = sshll.u32 %s3637_s27, 5  ;;  %s285_s20 = scalar_lea.sflag [#allocation6], %s3637_s27 }
  0x31   : > { %s3641_s30 = scalar_lea.vmem [#allocation5], %s2455_s18 }
  0x32   : > { %3458 = dma.done.wait (%p3599_p9), %s285_s20, 512  }
  0x33   : > { %3460 = vsyncadd (%p3599_p9), %s285_s20, 4294966784  ;;  %p329_p0 = scmp.lt.s32.totalorder %s3483_s25, 1  ;;  %p344_p1 = scmp.eq.s32.totalorder %s3479_s24, 0 }
  0x34   : > { %s3660_s11 = scalar_lea.vmem [#allocation8], %s2455_s18  ;;  %v372_v0 = vld [vmem:[%s3641_s30 + $0x18] sm:$0xff] (%p344_p1)  ;;  %vm528_vm0 = vcmask (%p344_p1), 1043456   ;;  %v371_v2 = vld [vmem:[%s3641_s30 + $0x10] sm:$0xff] (%p344_p1)  ;;  %v370_v4 = vld [vmem:[%s3641_s30 + $0x8] sm:$0xff] (%p344_p1)  ;;  %vm503_vm1 = vcmask (%p344_p1), 162816  }
  0x35   : > { %s330_s7 = scalar_select %p329_p0, %s3483_s25, 1  ;;  %2978 = vmatprep.subr.mxu0 (%p344_p1), %v372_v0  ;;  %v350_v6 = vld [vmem:[%s4775_s3] sm:$0xff] (%p344_p1)  ;;  %v369_v7 = vld [vmem:[%s3641_s30] sm:$0xff] (%p344_p1)  ;;  %v351_v8 = vld [vmem:[%s4775_s3 + $0x8] sm:$0xff] (%p344_p1)  ;;  %vm373_vm2 = vcmask (%p344_p1), 261120  }
  0x36   : > { %349 = sbr.rel (!%p344_p1) target bundleno = 277 (0x115), region = 52  ;;  %2979 = vmatpush3.msra.mxu0 (%p344_p1), %v372_v0  ;;  %v361_v9 = vld [vmem:[%s4776_s4] sm:$0xff] (%p344_p1)  ;;  %v352_v10 = vld [vmem:[%s4775_s3 + $0x10] sm:$0xff] (%p344_p1)  ;;  %3004 = vmatprep.mubr.msk.f32.mxu1 (%p344_p1), %vm503_vm1, %v350_v6  ;;  %v362_v11 = vld [vmem:[%s4776_s4 + $0x8] sm:$0xff] (%p344_p1) }
  0x37   : > { %s3240_s8 = smul.u32 24, %s330_s7  ;;  %s2458_s29 = sshll.u32 %s330_s7, 2  ;;  %2980 = vmatprep.subr.mxu0 (%p344_p1), %v371_v2  ;;  %v363_v12 = vld [vmem:[%s4776_s4 + $0x10] sm:$0xff] (%p344_p1)  ;;  %2986 = vmatprep.mubr.msk.f32.mxu0 (%p344_p1), %vm373_vm2, %v361_v9  ;;  %v353_v13 = vld [vmem:[%s4775_s3 + $0x18] sm:$0xff] (%p344_p1)  ;;  %v354_v14 = vld [vmem:[%s4775_s3 + $0x20] sm:$0xff] (%p344_p1) }
  0x38   : > { %s3653_s19 = scalar_lea.vmem %s4774_s2, %s2458_s29  ;;  %2981 = vmatpush3.msra.mxu0 (%p344_p1), %v371_v2  ;;  %v364_v15 = vld [vmem:[%s4776_s4 + $0x18] sm:$0xff] (%p344_p1)  ;;  %v365_v16 = vld [vmem:[%s4776_s4 + $0x20] sm:$0xff] (%p344_p1)  ;;  %v355_v17 = vld [vmem:[%s4775_s3 + $0x28] sm:$0xff] (%p344_p1) }
  0x39   : > { %s3658_s15 = scalar_lea.vmem %s4772_s0, %s3240_s8  ;;  %2982 = vmatprep.subr.mxu0 (%p344_p1), %v370_v4  ;;  %v356_v18 = vld [vmem:[%s4775_s3 + $0x30] sm:$0xff] (%p344_p1)  ;;  %v366_v19 = vld [vmem:[%s4776_s4 + $0x28] sm:$0xff] (%p344_p1)  ;;  %v357_v21 = vld [vmem:[%s4775_s3 + $0x38] sm:$0xff] (%p344_p1) }
  0x3a   : > { %v360_v1 = vld [vmem:[%s3658_s15 + $0x10] sm:$0xf] (%p344_p1)  ;;  %v359_v3 = vld [vmem:[%s3658_s15 + $0x8] sm:$0xff] (%p344_p1)  ;;  %v358_v5 = vld [vmem:[%s3658_s15] sm:$0xff] (%p344_p1)  ;;  %2983 = vmatpush3.msra.mxu0 (%p344_p1), %v370_v4 }
  0x3b   : > { %2998 = vmatprep.subr.msk.mxu1 %vm528_vm0, %v360_v1  ;;  %2984 = vmatprep.subr.mxu0 %v369_v7  ;;  %v367_v20 = vld [vmem:[%s4776_s4 + $0x30] sm:$0xff]  ;;  %v368_v22 = vld [vmem:[%s4776_s4 + $0x38] sm:$0xff] }
  0x3c   : > { %2999 = vmatpush3.msk.msra.mxu1 %vm528_vm0, %v360_v1  ;;  %2985 = vmatpush3.msra.mxu0 %v369_v7 }
  0x3d   : > { %3000 = vmatprep.subr.mxu1 %v359_v3  ;;  %2987 = vmatmul.mubr.msk.f32.vlgmr.msra.gmra.mxu0 %vm373_vm2, %v362_v11 }
  0x3e   : > { %3001 = vmatpush3.msra.mxu1 %v359_v3  ;;  %2989 = vmatprep.mubr.msk.f32.mxu0 %vm373_vm2, %v363_v12 }
  0x3f   : > { %3002 = vmatprep.subr.mxu1 %v358_v5 }
  0x40   : > { %3003 = vmatpush3.msra.mxu1 %v358_v5 }
  0x41   : > { %3005 = vmatmul.mubr.msk.f32.vlgmr.msra.gmra.mxu1 %vm503_vm1, %v351_v8  ;;  %2990 = vmatmul.mubr.msk.f32.gmra.mxu0 %vm373_vm2, %v364_v15 }
  0x42   : > { %3007 = vmatprep.mubr.msk.f32.mxu1 %vm503_vm1, %v352_v10  ;;  %2992 = vmatprep.mubr.msk.f32.mxu0 %vm373_vm2, %v365_v16 }
  0x45   : > { %3008 = vmatmul.mubr.msk.f32.gmra.mxu1 %vm503_vm1, %v353_v13  ;;  %2993 = vmatmul.mubr.msk.f32.gmra.mxu0 %vm373_vm2, %v366_v19 }
  0x46   : > { %3010 = vmatprep.mubr.msk.f32.mxu1 %vm503_vm1, %v354_v14  ;;  %2995 = vmatprep.mubr.msk.f32.mxu0 %vm373_vm2, %v367_v20 }
  0x49   : > { %3011 = vmatmul.mubr.msk.f32.gmra.mxu1 %vm503_vm1, %v355_v17  ;;  %2996 = vmatmul.mubr.msk.f32.gmra.mxu0 %vm373_vm2, %v368_v22 }
  0x4a   : > { %3013 = vmatprep.mubr.msk.f32.mxu1 %vm503_vm1, %v356_v18 }
  0x4d   : > { %3014 = vmatmul.mubr.msk.f32.gmra.mxu1 %vm503_vm1, %v357_v21 }
  0xfd   : > { %v2988_v24 = vpop.f32.mrf.mxu0 }
  0xff   : > { %v464_v26 = vpop.f32.mrf.mxu0 }
 0x101   : > { %v3006_v23 = vpop.f32.mrf.mxu1  ;;  %v2991_v30 = vpop.f32.mrf.mxu0 }
 0x102   : > { %v604_v28 = vadd.f32 %v3006_v23, %v2988_v24 }
 0x103   : > { %v598_v25 = vpop.f32.mrf.mxu1  ;;  %v474_v33 = vpop.f32.mrf.mxu0 }
 0x104   : > { %v599_v29 = vadd.f32 %v598_v25, %v464_v26 }
 0x105   : > { %v3009_v27 = vpop.f32.mrf.mxu1  ;;  %v2994_v37 = vpop.f32.mrf.mxu0 }
 0x106   : > { %v2807_v32 = vpack.c.bf16 %v604_v28, %v599_v29  ;;  %v614_v35 = vadd.f32 %v3009_v27, %v2991_v30 }
 0x107   : > { %v608_v31 = vpop.f32.mrf.mxu1  ;;  %v484_v40 = vpop.f32.mrf.mxu0 }
 0x108   : > { %2808 = vst [vmem:[#allocation2] sm:$0xff] %v2807_v32   ;;  %v609_v36 = vadd.f32 %v608_v31, %v474_v33 }
 0x109   : > { %v3012_v34 = vpop.f32.mrf.mxu1  ;;  %v2997_v44 = vpop.f32.mrf.mxu0 }
 0x10a   : > { %v2812_v39 = vpack.c.bf16 %v614_v35, %v609_v36  ;;  %v624_v42 = vadd.f32 %v3012_v34, %v2994_v37 }
 0x10b   : > { %v618_v38 = vpop.f32.mrf.mxu1  ;;  %v494_v47 = vpop.f32.mrf.mxu0 }
 0x10c   : > { %2834 = vst [vmem:[#allocation2 + $0x8] sm:$0xff] %v2812_v39   ;;  %v619_v43 = vadd.f32 %v618_v38, %v484_v40 }
 0x10d   : > { %v3015_v41 = vpop.f32.mrf.mxu1 }
 0x10e   : > { %v2817_v45 = vpack.c.bf16 %v624_v42, %v619_v43  ;;  %v634_v48 = vadd.f32 %v3015_v41, %v2997_v44 }
 0x10f   : > { %v628_v46 = vpop.f32.mrf.mxu1 }
 0x110   : > { %2835 = vst [vmem:[#allocation2 + $0x10] sm:$0xff] %v2817_v45   ;;  %v629_v49 = vadd.f32 %v628_v46, %v494_v47 }
 0x112   : > { %v2822_v50 = vpack.c.bf16 %v634_v48, %v629_v49 }
 0x114   : > { %2836 = vst [vmem:[#allocation2 + $0x18] sm:$0xff] %v2822_v50  }
 0x115 PF: > { %v3734_v51 = vld [vmem:[%s3653_s19] sm:$0xf]  ;;  %v3740_v53 = vld [vmem:[%s3658_s15 + $0x8] sm:$0xff]  ;;  %v689_v54 = vlaneseq  ;;  %v3743_v55 = vld [vmem:[%s3658_s15 + $0x10] sm:$0xf]  ;;  %p2485_p9 = scmp.ne.s32.totalorder %s3479_s24, 0 }
 0x116   : > { %v3737_v52 = vld [vmem:[%s3658_s15] sm:$0xff]  ;;  %v3746_v56 = vld [vmem:[%s3641_s30] sm:$0xff]  ;;  %v3749_v57 = vld [vmem:[%s3641_s30 + $0x8] sm:$0xff] }
 0x117   : > { %v3752_v58 = vld [vmem:[%s3641_s30 + $0x10] sm:$0xff]  ;;  %v3755_v59 = vld [vmem:[%s3641_s30 + $0x18] sm:$0xff]  ;;  %v3757_v60 = vshrl.u32 %v689_v54, 7 }
 0x118   : > { %708 = sbr.rel (%p2485_p9) target bundleno = 812 (0x32c), region = 56 }
 0x119   : > { %v3760_v61 = vadd.s32 8, %v3757_v60  ;;  %v3763_v62 = vadd.s32 16, %v3757_v60  ;;  %v3766_v63 = vadd.s32 24, %v3757_v60  ;;  %v3769_v0 = vadd.s32 32, %v3757_v60 }
 0x11a   : > { %v3772_v1 = vadd.s32 40, %v3757_v60  ;;  %v3775_v2 = vadd.s32 48, %v3757_v60  ;;  %v3778_v3 = vadd.s32 56, %v3757_v60  ;;  %v3781_v4 = vadd.s32 64, %v3757_v60 }
 0x11b   : > { %4793 = vst [vmem:[#allocation14_spill] sm:$0xff] %v3760_v61  ;;  %4794 = vst [vmem:[#allocation15_spill] sm:$0xff] %v3766_v63  ;;  %v3784_v5 = vadd.s32 72, %v3757_v60  ;;  %v3787_v6 = vadd.s32 80, %v3757_v60  ;;  %v3790_v7 = vadd.s32 88, %v3757_v60  ;;  %v3793_v8 = vadd.s32 96, %v3757_v60 }
 0x11c   : > { %v3796_v9 = vadd.s32 104, %v3757_v60  ;;  %v3799_v10 = vadd.s32 112, %v3757_v60  ;;  %v3802_v11 = vadd.s32 120, %v3757_v60 }
 0x11d   : > { %vm742_vm3 = vcmask 1042432   ;;  %v709_v12 = vld [vmem:[%s4777_s5] sm:$0xff]  ;;  %vm717_vm4 = vcmask 23552   ;;  %v861_v13 = vsub.s32 0, %v3757_v60  ;;  %v1010_v14 = vsub.s32 1, %v3757_v60  ;;  %v710_v15 = vld [vmem:[%s4777_s5 + $0x8] sm:$0xff] }
 0x11e   : > { %3016 = vmatprep.subr.msk.mxu0 %vm742_vm3, %v3737_v52  ;;  %3018 = vmatprep.mubr.msk.f32.mxu0 %vm717_vm4, %v709_v12  ;;  %v711_v16 = vld [vmem:[%s4777_s5 + $0x10] sm:$0xff]  ;;  %v712_v19 = vld [vmem:[%s4777_s5 + $0x18] sm:$0xff]  ;;  %v3500_v20 = vmov 1.0|1.0   ;;  %v713_v21 = vld [vmem:[%s4777_s5 + $0x20] sm:$0xff]  ;;  %v1143_v34 = vsub.s32 2, %v3757_v60 }
 0x11f   : > { %3017 = vmatpush3.msk.msra.mxu0 %vm742_vm3, %v3737_v52  ;;  %v3820_v17 = vrot.slane %v3734_v51, %v861_v13  ;;  %v3823_v18 = vrot.slane %v3734_v51, %v1010_v14  ;;  %v714_v24 = vld [vmem:[%s4777_s5 + $0x28] sm:$0xff]  ;;  %v3892_v25 = vld [vmem:[#allocation2] sm:$0xff]   ;;  %v715_v26 = vld [vmem:[%s4777_s5 + $0x30] sm:$0xff]  ;;  %v1276_v35 = vsub.s32 3, %v3757_v60 }
 0x120   : > { %3019 = vmatmul.mubr.msk.f32.vlgmr.msra.gmra.mxu0 %vm717_vm4, %v710_v15  ;;  %v716_v29 = vld [vmem:[%s4777_s5 + $0x38] sm:$0xff]  ;;  %3046 = vmatprep.mubr.bf16.mxu1 %v3892_v25  ;;  %v4016_v38 = vrot.slane %v3734_v51, %v1143_v34  ;;  %v4063_v42 = vld [vmem:[#allocation2 + $0x8] sm:$0xff]   ;;  %v4091_v45 = vld [vmem:[#allocation2 + $0x10] sm:$0xff]  }
 0x121   : > { %vm877_vm5 = vcmp.eq.s32.totalorder %v3799_v10, %v3820_v17  ;;  %vm878_vm6 = vcmp.eq.s32.totalorder %v3802_v11, %v3820_v17  ;;  %vm875_vm7 = vcmp.eq.s32.totalorder %v3793_v8, %v3820_v17  ;;  %vm876_vm8 = vcmp.eq.s32.totalorder %v3796_v9, %v3820_v17  ;;  %3021 = vmatprep.mubr.msk.f32.mxu0 %vm717_vm4, %v711_v16  ;;  %v4133_v49 = vld [vmem:[#allocation2 + $0x18] sm:$0xff]   ;;  %v1468_v15 = vld [vmem:[%s4775_s3 + $0x40] sm:$0xff]  ;;  %v1469_v16 = vld [vmem:[%s4775_s3 + $0x48] sm:$0xff] }
 0x122   : > { %vm2515_vm9 = vmpackc.low %vm878_vm6, %vm877_vm5  ;;  %vm1026_vm10 = vcmp.eq.s32.totalorder %v3799_v10, %v3823_v18  ;;  %vm1027_vm11 = vcmp.eq.s32.totalorder %v3802_v11, %v3823_v18  ;;  %vm1024_vm12 = vcmp.eq.s32.totalorder %v3793_v8, %v3823_v18  ;;  %vm1025_vm13 = vcmp.eq.s32.totalorder %v3796_v9, %v3823_v18 }
 0x123   : > { %3030 = vmatprep.subr.msk.bf16.mxu1 %vm2515_vm9, %v3500_v20  ;;  %vm2547_vm14 = vmpackc.low %vm1027_vm11, %vm1026_vm10  ;;  %vm873_vm15 = vcmp.eq.s32.totalorder %v3787_v6, %v3820_v17  ;;  %vm874_vm0 = vcmp.eq.s32.totalorder %v3790_v7, %v3820_v17  ;;  %vm1022_vm2 = vcmp.eq.s32.totalorder %v3787_v6, %v3823_v18  ;;  %vm1023_vm3 = vcmp.eq.s32.totalorder %v3790_v7, %v3823_v18 }
 0x124   : > { %3054 = vmatprep.subr.msk.bf16.mxu0 %vm2547_vm14, %v3500_v20  ;;  %3031 = vmatpush3.bf16.msk.msra.mxu1 %vm2515_vm9, %v3500_v20  ;;  %vm2517_vm1 = vmpackc.low %vm876_vm8, %vm875_vm7  ;;  %vm871_vm8 = vcmp.eq.s32.totalorder %v3781_v4, %v3820_v17  ;;  %vm872_vm9 = vcmp.eq.s32.totalorder %v3784_v5, %v3820_v17  ;;  %vm1020_vm10 = vcmp.eq.s32.totalorder %v3781_v4, %v3823_v18 }
 0x125   : > { %3055 = vmatpush3.bf16.msk.msra.mxu0 %vm2547_vm14, %v3500_v20  ;;  %3032 = vmatprep.subr.msk.bf16.mxu1 %vm2517_vm1, %v3500_v20  ;;  %vm2549_vm5 = vmpackc.low %vm1025_vm13, %vm1024_vm12  ;;  %vm1021_vm11 = vcmp.eq.s32.totalorder %v3784_v5, %v3823_v18  ;;  %vm869_vm14 = vcmp.eq.s32.totalorder %v3775_v2, %v3820_v17  ;;  %v4026_v39 = vrot.slane %v3734_v51, %v1276_v35 }
 0x126   : > { %3056 = vmatprep.subr.msk.bf16.mxu0 %vm2549_vm5, %v3500_v20  ;;  %vm3875_vm6 = vmpackc.low %vm874_vm0, %vm873_vm15  ;;  %3022 = vmatmul.mubr.msk.f32.gmra.mxu0 %vm717_vm4, %v712_v19  ;;  %vm870_vm15 = vcmp.eq.s32.totalorder %v3778_v3, %v3820_v17  ;;  %vm1018_vm0 = vcmp.eq.s32.totalorder %v3775_v2, %v3823_v18 }
 0x127   : > { %vm3880_vm7 = vmpackc.low %vm1023_vm3, %vm1022_vm2  ;;  %3024 = vmatprep.mubr.msk.f32.mxu0 %vm717_vm4, %v713_v21 }
 0x128   : > { %3033 = vmatpush3.bf16.msk.msra.mxu1 %vm2517_vm1, %v3500_v20  ;;  %vm3909_vm12 = vmpackc.low %vm872_vm9, %vm871_vm8  ;;  %vm1019_vm1 = vcmp.eq.s32.totalorder %v3778_v3, %v3823_v18 }
 0x129   : > { %3057 = vmatpush3.bf16.msk.msra.mxu0 %vm2549_vm5, %v3500_v20  ;;  %3034 = vmatprep.subr.msk.bf16.mxu1 %vm3875_vm6, %v3500_v20  ;;  %vm3914_vm13 = vmpackc.low %vm1021_vm11, %vm1020_vm10  ;;  %vm867_vm5 = vcmp.eq.s32.totalorder %v3769_v0, %v3820_v17  ;;  %vm865_vm10 = vcmp.eq.s32.totalorder %v3763_v62, %v3820_v17  ;;  %vm866_vm11 = vcmp.eq.s32.totalorder %v3766_v63, %v3820_v17 }
 0x12a   : > { %3058 = vmatprep.subr.msk.bf16.mxu0 %vm3880_vm7, %v3500_v20  ;;  %3025 = vmatmul.mubr.msk.f32.gmra.mxu0 %vm717_vm4, %v714_v24  ;;  %vm3943_vm2 = vmpackc.low %vm870_vm15, %vm869_vm14 }
 0x12b   : > { %3027 = vmatprep.mubr.msk.f32.mxu0 %vm717_vm4, %v715_v26  ;;  %vm3948_vm3 = vmpackc.low %vm1019_vm1, %vm1018_vm0  ;;  %vm863_vm0 = vcmp.eq.s32.totalorder %v3757_v60, %v3820_v17  ;;  %vm864_vm1 = vcmp.eq.s32.totalorder %v3760_v61, %v3820_v17 }
 0x12c   : > { %3035 = vmatpush3.bf16.msk.msra.mxu1 %vm3875_vm6, %v3500_v20  ;;  %vm868_vm6 = vcmp.eq.s32.totalorder %v3772_v1, %v3820_v17  ;;  %vm4003_vm14 = vmpackc.low %vm866_vm11, %vm865_vm10  ;;  %v1471_v17 = vld [vmem:[%s4775_s3 + $0x58] sm:$0xff] }
 0x12d   : > { %3059 = vmatpush3.bf16.msk.msra.mxu0 %vm3880_vm7, %v3500_v20  ;;  %3036 = vmatprep.subr.msk.bf16.mxu1 %vm3909_vm12, %v3500_v20  ;;  %vm1016_vm7 = vcmp.eq.s32.totalorder %v3769_v0, %v3823_v18  ;;  %vm3973_vm8 = vmpackc.low %vm868_vm6, %vm867_vm5 }
 0x12e   : > { %3060 = vmatprep.subr.msk.bf16.mxu0 %vm3914_vm13, %v3500_v20  ;;  %3028 = vmatmul.mubr.msk.f32.gmra.mxu0 %vm717_vm4, %v716_v29  ;;  %vm1017_vm4 = vcmp.eq.s32.totalorder %v3772_v1, %v3823_v18  ;;  %vm2529_vm5 = vmpackc.low %vm864_vm1, %vm863_vm0 }
 0x12f   : > { %3070 = vmatprep.mubr.bf16.mxu0 %v3892_v25  ;;  %vm3977_vm9 = vmpackc.low %vm1017_vm4, %vm1016_vm7  ;;  %vm1159_vm7 = vcmp.eq.s32.totalorder %v3799_v10, %v4016_v38  ;;  %vm1160_vm4 = vcmp.eq.s32.totalorder %v3802_v11, %v4016_v38 }
 0x130   : > { %3037 = vmatpush3.bf16.msk.msra.mxu1 %vm3909_vm12, %v3500_v20  ;;  %vm1014_vm12 = vcmp.eq.s32.totalorder %v3763_v62, %v3823_v18  ;;  %vm4059_vm10 = vmpackc.low %vm1160_vm4, %vm1159_vm7 }
 0x131   : > { %3061 = vmatpush3.bf16.msk.msra.mxu0 %vm3914_vm13, %v3500_v20  ;;  %3038 = vmatprep.subr.msk.bf16.mxu1 %vm3943_vm2, %v3500_v20  ;;  %vm1015_vm13 = vcmp.eq.s32.totalorder %v3766_v63, %v3823_v18 }
 0x132   : > { %3062 = vmatprep.subr.msk.bf16.mxu0 %vm3948_vm3, %v3500_v20  ;;  %vm4007_vm15 = vmpackc.low %vm1015_vm13, %vm1014_vm12  ;;  %vm1157_vm12 = vcmp.eq.s32.totalorder %v3793_v8, %v4016_v38  ;;  %vm1158_vm13 = vcmp.eq.s32.totalorder %v3796_v9, %v4016_v38 }
 0x133   : > { %vm4087_vm0 = vmpackc.low %vm1158_vm13, %vm1157_vm12 }
 0x134   : > { %3039 = vmatpush3.bf16.msk.msra.mxu1 %vm3943_vm2, %v3500_v20  ;;  %vm1012_vm2 = vcmp.eq.s32.totalorder %v3757_v60, %v3823_v18 }
 0x135   : > { %3063 = vmatpush3.bf16.msk.msra.mxu0 %vm3948_vm3, %v3500_v20  ;;  %3040 = vmatprep.subr.msk.bf16.mxu1 %vm3973_vm8, %v3500_v20  ;;  %vm1013_vm3 = vcmp.eq.s32.totalorder %v3760_v61, %v3823_v18 }
 0x136   : > { %3064 = vmatprep.subr.msk.bf16.mxu0 %vm3977_vm9, %v3500_v20  ;;  %vm4037_vm6 = vmpackc.low %vm1013_vm3, %vm1012_vm2  ;;  %vm1155_vm2 = vcmp.eq.s32.totalorder %v3787_v6, %v4016_v38  ;;  %vm1156_vm3 = vcmp.eq.s32.totalorder %v3790_v7, %v4016_v38 }
 0x137   : > { %vm4119_vm7 = vmpackc.low %vm1156_vm3, %vm1155_vm2 }
 0x138   : > { %3041 = vmatpush3.bf16.msk.msra.mxu1 %vm3973_vm8, %v3500_v20  ;;  %vm1292_vm8 = vcmp.eq.s32.totalorder %v3799_v10, %v4026_v39 }
 0x139   : > { %3065 = vmatpush3.bf16.msk.msra.mxu0 %vm3977_vm9, %v3500_v20  ;;  %3042 = vmatprep.subr.msk.bf16.mxu1 %vm4003_vm14, %v3500_v20  ;;  %vm1293_vm9 = vcmp.eq.s32.totalorder %v3802_v11, %v4026_v39 }
 0x13a   : > { %3066 = vmatprep.subr.msk.bf16.mxu0 %vm4007_vm15, %v3500_v20  ;;  %vm4065_vm11 = vmpackc.low %vm1293_vm9, %vm1292_vm8  ;;  %vm1153_vm8 = vcmp.eq.s32.totalorder %v3781_v4, %v4016_v38  ;;  %vm1154_vm9 = vcmp.eq.s32.totalorder %v3784_v5, %v4016_v38 }
 0x13b   : > { %vm4151_vm12 = vmpackc.low %vm1154_vm9, %vm1153_vm8 }
 0x13c   : > { %3043 = vmatpush3.bf16.msk.msra.mxu1 %vm4003_vm14, %v3500_v20  ;;  %vm1290_vm14 = vcmp.eq.s32.totalorder %v3793_v8, %v4026_v39 }
 0x13d   : > { %3067 = vmatpush3.bf16.msk.msra.mxu0 %vm4007_vm15, %v3500_v20  ;;  %3044 = vmatprep.subr.msk.bf16.mxu1 %vm2529_vm5, %v3500_v20  ;;  %vm1291_vm15 = vcmp.eq.s32.totalorder %v3796_v9, %v4026_v39 }
 0x13e   : > { %3068 = vmatprep.subr.msk.bf16.mxu0 %vm4037_vm6, %v3500_v20  ;;  %vm4094_vm1 = vmpackc.low %vm1291_vm15, %vm1290_vm14  ;;  %vm1151_vm14 = vcmp.eq.s32.totalorder %v3775_v2, %v4016_v38  ;;  %vm1152_vm15 = vcmp.eq.s32.totalorder %v3778_v3, %v4016_v38 }
 0x13f   : > { %vm4181_vm2 = vmpackc.low %vm1152_vm15, %vm1151_vm14 }
 0x140   : > { %3045 = vmatpush3.bf16.msk.msra.mxu1 %vm2529_vm5, %v3500_v20  ;;  %vm1288_vm5 = vcmp.eq.s32.totalorder %v3787_v6, %v4026_v39 }
 0x141   : > { %3069 = vmatpush3.bf16.msk.msra.mxu0 %vm4037_vm6, %v3500_v20  ;;  %3078 = vmatprep.subr.msk.bf16.mxu1 %vm4059_vm10, %v3500_v20  ;;  %vm1289_vm6 = vcmp.eq.s32.totalorder %v3790_v7, %v4026_v39 }
 0x142   : > { %3102 = vmatprep.subr.msk.bf16.mxu0 %vm4065_vm11, %v3500_v20  ;;  %vm4124_vm4 = vmpackc.low %vm1289_vm6, %vm1288_vm5  ;;  %vm1149_vm5 = vcmp.eq.s32.totalorder %v3769_v0, %v4016_v38  ;;  %vm1150_vm6 = vcmp.eq.s32.totalorder %v3772_v1, %v4016_v38 }
 0x143   : > { %3047 = vmatmul.mubr.bf16.vlgmr.msra.gmra.mxu1 %v4063_v42  ;;  %vm2589_vm8 = vmpackc.low %vm1150_vm6, %vm1149_vm5 }
 0x144   : > { %3071 = vmatmul.mubr.bf16.vlgmr.msra.gmra.mxu0 %v4063_v42  ;;  %3079 = vmatpush3.bf16.msk.msra.mxu1 %vm4059_vm10, %v3500_v20  ;;  %vm1286_vm10 = vcmp.eq.s32.totalorder %v3781_v4, %v4026_v39 }
 0x145   : > { %3103 = vmatpush3.bf16.msk.msra.mxu0 %vm4065_vm11, %v3500_v20  ;;  %3080 = vmatprep.subr.msk.bf16.mxu1 %vm4087_vm0, %v3500_v20  ;;  %vm1287_vm11 = vcmp.eq.s32.totalorder %v3784_v5, %v4026_v39 }
 0x146   : > { %3104 = vmatprep.subr.msk.bf16.mxu0 %vm4094_vm1, %v3500_v20  ;;  %3050 = vmatprep.mubr.bf16.mxu1 %v4091_v45  ;;  %vm4155_vm13 = vmpackc.low %vm1287_vm11, %vm1286_vm10  ;;  %vm1147_vm10 = vcmp.eq.s32.totalorder %v3763_v62, %v4016_v38  ;;  %vm1148_vm11 = vcmp.eq.s32.totalorder %v3766_v63, %v4016_v38 }
 0x147   : > { %3074 = vmatprep.mubr.bf16.mxu0 %v4091_v45  ;;  %vm2591_vm14 = vmpackc.low %vm1148_vm11, %vm1147_vm10 }
 0x148   : > { %3081 = vmatpush3.bf16.msk.msra.mxu1 %vm4087_vm0, %v3500_v20  ;;  %vm1284_vm0 = vcmp.eq.s32.totalorder %v3775_v2, %v4026_v39 }
 0x149   : > { %3105 = vmatpush3.bf16.msk.msra.mxu0 %vm4094_vm1, %v3500_v20  ;;  %3082 = vmatprep.subr.msk.bf16.mxu1 %vm4119_vm7, %v3500_v20  ;;  %vm1285_vm1 = vcmp.eq.s32.totalorder %v3778_v3, %v4026_v39 }
 0x14a   : > { %3106 = vmatprep.subr.msk.bf16.mxu0 %vm4124_vm4, %v3500_v20  ;;  %vm4186_vm3 = vmpackc.low %vm1285_vm1, %vm1284_vm0  ;;  %vm1145_vm0 = vcmp.eq.s32.totalorder %v3757_v60, %v4016_v38  ;;  %vm1146_vm1 = vcmp.eq.s32.totalorder %v3760_v61, %v4016_v38 }
 0x14b   : > { %3051 = vmatmul.mubr.bf16.gmra.mxu1 %v4133_v49  ;;  %vm2593_vm5 = vmpackc.low %vm1146_vm1, %vm1145_vm0 }
 0x14c   : > { %3083 = vmatpush3.bf16.msk.msra.mxu1 %vm4119_vm7, %v3500_v20  ;;  %3075 = vmatmul.mubr.bf16.gmra.mxu0 %v4133_v49  ;;  %vm1282_vm7 = vcmp.eq.s32.totalorder %v3769_v0, %v4026_v39 }
 0x14d   : > { %3107 = vmatpush3.bf16.msk.msra.mxu0 %vm4124_vm4, %v3500_v20  ;;  %3084 = vmatprep.subr.msk.bf16.mxu1 %vm4151_vm12, %v3500_v20  ;;  %vm1283_vm4 = vcmp.eq.s32.totalorder %v3772_v1, %v4026_v39 }
 0x14e   : > { %3108 = vmatprep.subr.msk.bf16.mxu0 %vm4155_vm13, %v3500_v20  ;;  %3094 = vmatprep.mubr.bf16.mxu1 %v3892_v25  ;;  %vm4211_vm9 = vmpackc.low %vm1283_vm4, %vm1282_vm7  ;;  %vm1591_vm7 = vcmask 1043456   ;;  %vm1578_vm4 = vcmask 162816  }
 0x14f   : > { %3118 = vmatprep.mubr.bf16.mxu0 %v3892_v25 }
 0x150   : > { %3085 = vmatpush3.bf16.msk.msra.mxu1 %vm4151_vm12, %v3500_v20  ;;  %vm1280_vm12 = vcmp.eq.s32.totalorder %v3763_v62, %v4026_v39 }
 0x151   : > { %3109 = vmatpush3.bf16.msk.msra.mxu0 %vm4155_vm13, %v3500_v20  ;;  %3086 = vmatprep.subr.msk.bf16.mxu1 %vm4181_vm2, %v3500_v20  ;;  %vm1281_vm13 = vcmp.eq.s32.totalorder %v3766_v63, %v4026_v39 }
 0x152   : > { %3110 = vmatprep.subr.msk.bf16.mxu0 %vm4186_vm3, %v3500_v20  ;;  %vm2623_vm15 = vmpackc.low %vm1281_vm13, %vm1280_vm12 }
 0x154   : > { %3087 = vmatpush3.bf16.msk.msra.mxu1 %vm4181_vm2, %v3500_v20  ;;  %vm1278_vm2 = vcmp.eq.s32.totalorder %v3757_v60, %v4026_v39 }
 0x155   : > { %3111 = vmatpush3.bf16.msk.msra.mxu0 %vm4186_vm3, %v3500_v20  ;;  %3088 = vmatprep.subr.msk.bf16.mxu1 %vm2589_vm8, %v3500_v20  ;;  %vm1279_vm3 = vcmp.eq.s32.totalorder %v3760_v61, %v4026_v39 }
 0x156   : > { %3112 = vmatprep.subr.msk.bf16.mxu0 %vm4211_vm9, %v3500_v20  ;;  %vm2625_vm6 = vmpackc.low %vm1279_vm3, %vm1278_vm2 }
 0x158   : > { %3089 = vmatpush3.bf16.msk.msra.mxu1 %vm2589_vm8, %v3500_v20  ;;  %vm1480_vm8 = vcmask 261120  }
 0x159   : > { %3113 = vmatpush3.bf16.msk.msra.mxu0 %vm4211_vm9, %v3500_v20  ;;  %3090 = vmatprep.subr.msk.bf16.mxu1 %vm2591_vm14, %v3500_v20 }
 0x15a   : > { %3114 = vmatprep.subr.msk.bf16.mxu0 %vm2623_vm15, %v3500_v20 }
 0x15c   : > { %3091 = vmatpush3.bf16.msk.msra.mxu1 %vm2591_vm14, %v3500_v20 }
 0x15d   : > { %3115 = vmatpush3.bf16.msk.msra.mxu0 %vm2623_vm15, %v3500_v20  ;;  %3092 = vmatprep.subr.msk.bf16.mxu1 %vm2593_vm5, %v3500_v20 }
 0x15e   : > { %3116 = vmatprep.subr.msk.bf16.mxu0 %vm2625_vm6, %v3500_v20 }
 0x160   : > { %3093 = vmatpush3.bf16.msk.msra.mxu1 %vm2593_vm5, %v3500_v20 }
 0x161   : > { %3117 = vmatpush3.bf16.msk.msra.mxu0 %vm2625_vm6, %v3500_v20 }
 0x162   : > { %3140 = vmatprep.subr.msk.mxu0 %vm1591_vm7, %v3743_v55 }
 0x163   : > { %3095 = vmatmul.mubr.bf16.vlgmr.msra.gmra.mxu1 %v4063_v42 }
 0x164   : > { %3119 = vmatmul.mubr.bf16.vlgmr.msra.gmra.mxu0 %v4063_v42  ;;  %3098 = vmatprep.mubr.bf16.mxu1 %v4091_v45 }
 0x165   : > { %3122 = vmatprep.mubr.bf16.mxu0 %v4091_v45  ;;  %3141 = vmatpush3.msk.msra.mxu0 %vm1591_vm7, %v3743_v55  ;;  %v1472_v55 = vld [vmem:[%s4776_s4 + $0x40] sm:$0xff] }
 0x166   : > { %3142 = vmatprep.subr.mxu0 %v3740_v53 }
 0x167   : > { %3143 = vmatpush3.msra.mxu0 %v3740_v53  ;;  %v1470_v53 = vld [vmem:[%s4775_s3 + $0x50] sm:$0xff] }
 0x168   : > { %3144 = vmatprep.subr.mxu0 %v3737_v52 }
 0x169   : > { %3145 = vmatpush3.msra.mxu0 %v3737_v52 }
 0x16b   : > { %3099 = vmatmul.mubr.bf16.gmra.mxu1 %v4133_v49 }
 0x16c   : > { %3123 = vmatmul.mubr.bf16.gmra.mxu0 %v4133_v49  ;;  %3134 = vmatprep.mubr.msk.f32.mxu1 %vm1480_vm8, %v1472_v55 }
 0x16d   : > { %3146 = vmatprep.mubr.msk.f32.mxu0 %vm1578_vm4, %v1468_v15 }
 0x174   : > { %3147 = vmatmul.mubr.msk.f32.vlgmr.msra.gmra.mxu0 %vm1578_vm4, %v1469_v16 }
 0x175   : > { %3149 = vmatprep.mubr.msk.f32.mxu0 %vm1578_vm4, %v1470_v53 }
 0x178   : > { %3150 = vmatmul.mubr.msk.f32.gmra.mxu0 %vm1578_vm4, %v1471_v17 }
 0x1e0   : > { %v3020_v18 = vpop.f32.mrf.mxu0 }
 0x1e2   : > { %v812_v19 = vpop.f32.mrf.mxu0 }
 0x1e6   : > { %v3023_v20 = vpop.f32.mrf.mxu0 }
 0x1e8   : > { %v822_v21 = vpop.f32.mrf.mxu0 }
 0x1ea   : > { %v4281_v22 = vpop.f32.mrf.mxu0 }
 0x1ec   : > { %v4283_v23 = vpop.f32.mrf.mxu0 }
 0x1ee   : > { %v4285_v24 = vpop.f32.mrf.mxu0 }
 0x1f0   : > { %v4287_v25 = vpop.f32.mrf.mxu0 }
 0x203   : > { %v3048_v26 = vpop.f32.mrf.mxu1 }
 0x204   : > { %v3072_v27 = vpop.f32.mrf.mxu0 }
 0x205   : > { %v977_v28 = vpop.f32.mrf.mxu1  ;;  %v1135_v41 = vmax.f32 %v3048_v26, %v3072_v27 }
 0x206   : > { %v1102_v29 = vpop.f32.mrf.mxu0 }
 0x207   : > { %v3049_v30 = vpop.f32.mrf.mxu1  ;;  %v1133_v44 = vmax.f32 %v977_v28, %v1102_v29 }
 0x208   : > { %v3073_v31 = vpop.f32.mrf.mxu0 }
 0x209   : > { %v980_v32 = vpop.f32.mrf.mxu1  ;;  %v1136_v48 = vmax.f32 %v3049_v30, %v3073_v31 }
 0x20a   : > { %v1105_v33 = vpop.f32.mrf.mxu0 }
 0x20b   : > { %v3052_v34 = vpop.f32.mrf.mxu1  ;;  %v1134_v13 = vmax.f32 %v980_v32, %v1105_v33 }
 0x20c   : > { %v3076_v35 = vpop.f32.mrf.mxu0 }
 0x20d   : > { %v993_v36 = vpop.f32.mrf.mxu1  ;;  %v1139_v28 = vmax.f32 %v3052_v34, %v3076_v35 }
 0x20e   : > { %v1118_v37 = vpop.f32.mrf.mxu0 }
 0x20f   : > { %v3053_v38 = vpop.f32.mrf.mxu1  ;;  %v1137_v29 = vmax.f32 %v993_v36, %v1118_v37 }
 0x210   : > { %v3077_v39 = vpop.f32.mrf.mxu0 }
 0x211   : > { %v996_v40 = vpop.f32.mrf.mxu1 }
 0x212   : > { %v1121_v42 = vpop.f32.mrf.mxu0 }
 0x223   : > { %v3096_v43 = vpop.f32.mrf.mxu1 }
 0x224   : > { %v1268_v45 = vmax.f32 %v1135_v41, %v3096_v43  ;;  %v3120_v46 = vpop.f32.mrf.mxu0 }
 0x225   : > { %v1235_v47 = vpop.f32.mrf.mxu1 }
 0x226   : > { %v1401_v49 = vmax.f32 %v1268_v45, %v3120_v46  ;;  %v1266_v50 = vmax.f32 %v1133_v44, %v1235_v47  ;;  %v1368_v54 = vpop.f32.mrf.mxu0  ;;  %v1140_v45 = vmax.f32 %v3053_v38, %v3077_v39 }
 0x227   : > { %v3097_v12 = vpop.f32.mrf.mxu1 }
 0x228   : > { %v1409_v14 = vsub.f32 %v1401_v49, %v822_v21  ;;  %v1399_v15 = vmax.f32 %v1266_v50, %v1368_v54  ;;  %v1269_v16 = vmax.f32 %v1136_v48, %v3097_v12  ;;  %v3121_v55 = vpop.f32.mrf.mxu0 }
 0x229   : > { %v1238_v53 = vpop.f32.mrf.mxu1 }
 0x22a   : > { %v2629_v17 = vmul.f32 -1.442695, %v1409_v14  ;;  %v1407_v61 = vsub.f32 %v1399_v15, %v812_v19  ;;  %v1402_v26 = vmax.f32 %v1269_v16, %v3121_v55  ;;  %v1267_v27 = vmax.f32 %v1134_v13, %v1238_v53  ;;  %v1371_v63 = vpop.f32.mrf.mxu0 }
 0x22b   : > { %v3100_v41 = vpop.f32.mrf.mxu1  ;;  %v1138_v19 = vmax.f32 %v996_v40, %v1121_v42 }
 0x22c   : > { %3329 = vpow2.f32 %v2629_v17  ;;  %v2627_v30 = vmul.f32 -1.442695, %v1407_v61  ;;  %v1410_v31 = vsub.f32 %v1402_v26, %v3023_v20  ;;  %v1400_v43 = vmax.f32 %v1267_v27, %v1371_v63  ;;  %v3124_v44 = vpop.f32.mrf.mxu0 }
 0x22d   : > { %v1272_v32 = vmax.f32 %v1139_v28, %v3100_v41  ;;  %v1251_v21 = vpop.f32.mrf.mxu1 }
 0x22e   : > { %3331 = vpow2.f32 %v2627_v30  ;;  %v2630_v33 = vmul.f32 -1.442695, %v1410_v31  ;;  %v1408_v46 = vsub.f32 %v1400_v43, %v3020_v18  ;;  %v1270_v47 = vmax.f32 %v1137_v29, %v1251_v21  ;;  %v1384_v48 = vpop.f32.mrf.mxu0 }
 0x22f   : > { %v1405_v49 = vmax.f32 %v1272_v32, %v3124_v44  ;;  %v3101_v50 = vpop.f32.mrf.mxu1 }
 0x230   : > { %3333 = vpow2.f32 %v2630_v33  ;;  %v2628_v34 = vmul.f32 -1.442695, %v1408_v46  ;;  %v1403_v35 = vmax.f32 %v1270_v47, %v1384_v48  ;;  %v1273_v36 = vmax.f32 %v1140_v45, %v3101_v50  ;;  %v3125_v37 = vpop.f32.mrf.mxu0 }
 0x231   : > { %v1413_v61 = vsub.f32 %v1405_v49, %v4287_v25  ;;  %v1254_v63 = vpop.f32.mrf.mxu1 }
 0x232   : > { %3335 = vpow2.f32 %v2628_v34  ;;  %v1411_v20 = vsub.f32 %v1403_v35, %v4283_v23  ;;  %v1406_v38 = vmax.f32 %v1273_v36, %v3125_v37  ;;  %v1271_v39 = vmax.f32 %v1138_v19, %v1254_v63  ;;  %v1387_v18 = vpop.f32.mrf.mxu0  ;;  %v1473_v35 = vld [vmem:[%s4776_s4 + $0x48] sm:$0xff]  ;;  %v1474_v36 = vld [vmem:[%s4776_s4 + $0x50] sm:$0xff]  ;;  %v1475_v37 = vld [vmem:[%s4776_s4 + $0x58] sm:$0xff] }
 0x233   : > { %v2633_v54 = vmul.f32 -1.442695, %v1413_v61 }
 0x234   : > { %v2631_v12 = vmul.f32 -1.442695, %v1411_v20  ;;  %v1414_v40 = vsub.f32 %v1406_v38, %v4285_v24  ;;  %v1404_v42 = vmax.f32 %v1271_v39, %v1387_v18  ;;  %v3148_v61 = vpop.f32.mrf.mxu0 }
 0x235   : > { %3337 = vpow2.f32 %v2633_v54 }
 0x236   : > { %v2634_v13 = vmul.f32 -1.442695, %v1414_v40  ;;  %v1412_v14 = vsub.f32 %v1404_v42, %v4281_v22  ;;  %3339 = vpow2.f32 %v2631_v12  ;;  %v1661_v63 = vpop.f32.mrf.mxu0 }
 0x238   : > { %3341 = vpow2.f32 %v2634_v13  ;;  %v2632_v15 = vmul.f32 -1.442695, %v1412_v14  ;;  %v3151_v39 = vpop.f32.mrf.mxu0 }
 0x239   : > { %v3330_v25 = vpop.eup %3329 }
 0x23a   : > { %v1441_v16 = vadd.f32 1.0, %v3330_v25  ;;  %3343 = vpow2.f32 %v2632_v15  ;;  %v1671_v13 = vpop.f32.mrf.mxu0 }
 0x23b   : > { %v3332_v55 = vpop.eup %3331 }
 0x23c   : > { %3345 = vrcp.f32 %v1441_v16  ;;  %v1439_v23 = vadd.f32 1.0, %v3332_v55 }
 0x23d   : > { %v3334_v53 = vpop.eup %3333 }
 0x23e   : > { %3347 = vrcp.f32 %v1439_v23  ;;  %v1442_v17 = vadd.f32 1.0, %v3334_v53 }
 0x23f   : > { %v3336_v26 = vpop.eup %3335 }
 0x240   : > { %3349 = vrcp.f32 %v1442_v17  ;;  %v1440_v24 = vadd.f32 1.0, %v3336_v26 }
 0x242   : > { %v3338_v27 = vpop.eup %3337  ;;  %3351 = vrcp.f32 %v1440_v24 }
 0x243   : > { %v1445_v28 = vadd.f32 1.0, %v3338_v27  ;;  %v3340_v29 = vpop.eup %3339 }
 0x244   : > { %v1443_v31 = vadd.f32 1.0, %v3340_v29 }
 0x245   : > { %v3342_v22 = vpop.eup %3341  ;;  %3353 = vrcp.f32 %v1445_v28 }
 0x246   : > { %v1446_v41 = vadd.f32 1.0, %v3342_v22 }
 0x247   : > { %v3344_v30 = vpop.eup %3343 }
 0x248   : > { %v1444_v43 = vadd.f32 1.0, %v3344_v30  ;;  %3355 = vrcp.f32 %v1446_v41 }
 0x249   : > { %v3346_v44 = vpop.eup %3345 }
 0x24a   : > { %1466 = vst [vmem:[#allocation4 + $0x18] sm:$0xff] %v3346_v44  ;;  %3357 = vrcp.f32 %v1444_v43 }
 0x24b   : > { %v3348_v45 = vpop.eup %3347  ;;  %3359 = vrcp.f32 %v1443_v31 }
 0x24c   : > { %1464 = vst [vmem:[#allocation4 + $0x10] sm:$0xff] %v3348_v45 }
 0x24d   : > { %v3350_v32 = vpop.eup %3349 }
 0x24e   : > { %1467 = vst [vmem:[#allocation4 + $0x8] sm:$0xff] %v3350_v32 }
 0x24f   : > { %v3352_v21 = vpop.eup %3351 }
 0x250   : > { %1465 = vst [vmem:[#allocation4] sm:$0xff] %v3352_v21 }
 0x252   : > { %v3354_v33 = vpop.eup %3353 }
 0x253   : > { %v1478_v19 = vmul.f32 %v3354_v33, %v3752_v58 }
 0x255   : > { %v3356_v46 = vpop.eup %3355 }
 0x256   : > { %v1479_v47 = vmul.f32 %v3356_v46, %v3755_v59 }
 0x257   : > { %v3358_v48 = vpop.eup %3357 }
 0x258   : > { %3126 = vmatprep.subr.mxu1 %v1479_v47  ;;  %v3360_v49 = vpop.eup %3359  ;;  %v1477_v50 = vmul.f32 %v3358_v48, %v3749_v57 }
 0x259   : > { %3127 = vmatpush3.msra.mxu1 %v1479_v47  ;;  %v1476_v34 = vmul.f32 %v3360_v49, %v3746_v56 }
 0x25a   : > { %3128 = vmatprep.subr.mxu1 %v1478_v19 }
 0x25b   : > { %3129 = vmatpush3.msra.mxu1 %v1478_v19 }
 0x25c   : > { %3130 = vmatprep.subr.mxu1 %v1477_v50 }
 0x25d   : > { %3131 = vmatpush3.msra.mxu1 %v1477_v50 }
 0x25e   : > { %3132 = vmatprep.subr.mxu1 %v1476_v34 }
 0x25f   : > { %3133 = vmatpush3.msra.mxu1 %v1476_v34 }
 0x260   : > { %3135 = vmatmul.mubr.msk.f32.vlgmr.msra.gmra.mxu1 %vm1480_vm8, %v1473_v35 }
 0x261   : > { %3137 = vmatprep.mubr.msk.f32.mxu1 %vm1480_vm8, %v1474_v36 }
 0x264   : > { %3138 = vmatmul.mubr.msk.f32.gmra.mxu1 %vm1480_vm8, %v1475_v37 }
 0x320   : > { %v3136_v20 = vpop.f32.mrf.mxu1 }
 0x321   : > { %v1667_v54 = vadd.f32 %v3148_v61, %v3136_v20 }
 0x322   : > { %v1559_v38 = vpop.f32.mrf.mxu1 }
 0x323   : > { %v1662_v18 = vadd.f32 %v1661_v63, %v1559_v38 }
 0x324   : > { %v3139_v12 = vpop.f32.mrf.mxu1 }
 0x325   : > { %v2827_v40 = vpack.c.bf16 %v1667_v54, %v1662_v18  ;;  %v1677_v14 = vadd.f32 %v3151_v39, %v3139_v12 }
 0x326   : > { %v1569_v42 = vpop.f32.mrf.mxu1 }
 0x327   : > { %2828 = vst [vmem:[#allocation3] sm:$0xff] %v2827_v40   ;;  %v1672_v15 = vadd.f32 %v1671_v13, %v1569_v42 }
 0x329   : > { %v2832_v25 = vpack.c.bf16 %v1677_v14, %v1672_v15 }
 0x32b   : > { %2837 = vst [vmem:[#allocation3 + $0x8] sm:$0xff] %v2832_v25  }
 0x32c PF: > { %p2648_p4 = scmp.ne.s32.totalorder %s3479_s24, 1 }
 0x32e   : > { %1705 = sbr.rel (%p2648_p4) target bundleno = 1113 (0x459), region = 60 }
 0x333   : > { %vm1723_vm9 = vcmask 1042432   ;;  %v1706_v16 = vld [vmem:[%s4777_s5 + $0x40] sm:$0xff]  ;;  %vm1710_vm10 = vcmask 23552   ;;  %v1818_v55 = vsub.s32 0, %v3757_v60  ;;  %v1939_v23 = vsub.s32 1, %v3757_v60  ;;  %v1707_v53 = vld [vmem:[%s4777_s5 + $0x48] sm:$0xff] }
 0x334   : > { %3152 = vmatprep.subr.msk.mxu0 %vm1723_vm9, %v3737_v52  ;;  %3154 = vmatprep.mubr.msk.f32.mxu0 %vm1710_vm10, %v1706_v16  ;;  %v1708_v17 = vld [vmem:[%s4777_s5 + $0x50] sm:$0xff]  ;;  %v4327_v24 = vld [vmem:[#allocation3] sm:$0xff]   ;;  %v1709_v28 = vld [vmem:[%s4777_s5 + $0x58] sm:$0xff]  ;;  %v2052_v45 = vsub.s32 2, %v3757_v60  ;;  %v2165_v32 = vsub.s32 3, %v3757_v60 }
 0x335   : > { %3153 = vmatpush3.msk.msra.mxu0 %vm1723_vm9, %v3737_v52  ;;  %v4325_v26 = vrot.slane %v3734_v51, %v1818_v55  ;;  %v4330_v27 = vrot.slane %v3734_v51, %v1939_v23  ;;  %3176 = vmatprep.mubr.bf16.mxu1 %v4327_v24  ;;  %v3501_v52 = vmov 1.0|1.0   ;;  %v4851_v44 = vld [vmem:[#allocation15_spill] sm:$0xff]  ;;  %v4856_v46 = vld [vmem:[#allocation14_spill] sm:$0xff]  ;;  %v4536_v49 = vld [vmem:[#allocation3 + $0x8] sm:$0xff]  }
 0x336   : > { %3155 = vmatmul.mubr.msk.f32.vlgmr.msra.gmra.mxu0 %vm1710_vm10, %v1707_v53  ;;  %v4489_v47 = vrot.slane %v3734_v51, %v2052_v45  ;;  %v4499_v48 = vrot.slane %v3734_v51, %v2165_v32  ;;  %v2287_v22 = vld [vmem:[#allocation4 + $0x18] sm:$0xff]  ;;  %v2285_v41 = vld [vmem:[#allocation4 + $0x10] sm:$0xff]  ;;  %v2288_v31 = vld [vmem:[#allocation4 + $0x8] sm:$0xff] }
 0x337   : > { %vm1834_vm11 = vcmp.eq.s32.totalorder %v3799_v10, %v4325_v26  ;;  %vm1835_vm12 = vcmp.eq.s32.totalorder %v3802_v11, %v4325_v26  ;;  %vm1832_vm13 = vcmp.eq.s32.totalorder %v3793_v8, %v4325_v26  ;;  %vm1833_vm14 = vcmp.eq.s32.totalorder %v3796_v9, %v4325_v26  ;;  %3157 = vmatprep.mubr.msk.f32.mxu0 %vm1710_vm10, %v1708_v17 }
 0x338   : > { %vm2672_vm15 = vmpackc.low %vm1835_vm12, %vm1834_vm11  ;;  %vm1955_vm0 = vcmp.eq.s32.totalorder %v3799_v10, %v4330_v27  ;;  %vm1956_vm1 = vcmp.eq.s32.totalorder %v3802_v11, %v4330_v27  ;;  %vm1953_vm2 = vcmp.eq.s32.totalorder %v3793_v8, %v4330_v27  ;;  %vm1954_vm3 = vcmp.eq.s32.totalorder %v3796_v9, %v4330_v27 }
 0x339   : > { %3160 = vmatprep.subr.msk.bf16.mxu1 %vm2672_vm15, %v3501_v52  ;;  %vm2704_vm5 = vmpackc.low %vm1956_vm1, %vm1955_vm0  ;;  %vm1830_vm6 = vcmp.eq.s32.totalorder %v3787_v6, %v4325_v26  ;;  %vm1831_vm7 = vcmp.eq.s32.totalorder %v3790_v7, %v4325_v26  ;;  %vm1951_vm8 = vcmp.eq.s32.totalorder %v3787_v6, %v4330_v27  ;;  %vm1952_vm9 = vcmp.eq.s32.totalorder %v3790_v7, %v4330_v27 }
 0x33a   : > { %3180 = vmatprep.subr.msk.bf16.mxu0 %vm2704_vm5, %v3501_v52  ;;  %3161 = vmatpush3.bf16.msk.msra.mxu1 %vm2672_vm15, %v3501_v52  ;;  %vm2674_vm4 = vmpackc.low %vm1833_vm14, %vm1832_vm13  ;;  %vm1828_vm14 = vcmp.eq.s32.totalorder %v3781_v4, %v4325_v26  ;;  %vm1829_vm15 = vcmp.eq.s32.totalorder %v3784_v5, %v4325_v26  ;;  %vm1949_vm0 = vcmp.eq.s32.totalorder %v3781_v4, %v4330_v27  ;;  %v2291_v30 = vsub.f32 1.0, %v2287_v22 }
 0x33b   : > { %3181 = vmatpush3.bf16.msk.msra.mxu0 %vm2704_vm5, %v3501_v52  ;;  %3162 = vmatprep.subr.msk.bf16.mxu1 %vm2674_vm4, %v3501_v52  ;;  %vm2706_vm11 = vmpackc.low %vm1954_vm3, %vm1953_vm2  ;;  %vm1950_vm1 = vcmp.eq.s32.totalorder %v3784_v5, %v4330_v27  ;;  %vm1826_vm3 = vcmp.eq.s32.totalorder %v3775_v2, %v4325_v26  ;;  %vm1827_vm5 = vcmp.eq.s32.totalorder %v3778_v3, %v4325_v26  ;;  %v2289_v43 = vsub.f32 1.0, %v2285_v41 }
 0x33c   : > { %3182 = vmatprep.subr.msk.bf16.mxu0 %vm2706_vm11, %v3501_v52  ;;  %vm4380_vm12 = vmpackc.low %vm1831_vm7, %vm1830_vm6  ;;  %3158 = vmatmul.mubr.msk.f32.gmra.mxu0 %vm1710_vm10, %v1709_v28  ;;  %vm1947_vm6 = vcmp.eq.s32.totalorder %v3775_v2, %v4330_v27  ;;  %vm1948_vm7 = vcmp.eq.s32.totalorder %v3778_v3, %v4330_v27  ;;  %v2295_v45 = vmul.f32 %v2291_v30, %v3752_v58  ;;  %v2292_v32 = vsub.f32 1.0, %v2288_v31 }
 0x33d   : > { %vm4384_vm13 = vmpackc.low %vm1952_vm9, %vm1951_vm8  ;;  %3196 = vmatprep.mubr.bf16.mxu0 %v4327_v24  ;;  %vm1824_vm9 = vcmp.eq.s32.totalorder %v3769_v0, %v4325_v26 }
 0x33e   : > { %3163 = vmatpush3.bf16.msk.msra.mxu1 %vm2674_vm4, %v3501_v52  ;;  %vm2678_vm2 = vmpackc.low %vm1829_vm15, %vm1828_vm14 }
 0x33f   : > { %3183 = vmatpush3.bf16.msk.msra.mxu0 %vm2706_vm11, %v3501_v52  ;;  %3164 = vmatprep.subr.msk.bf16.mxu1 %vm4380_vm12, %v3501_v52  ;;  %vm4406_vm10 = vmpackc.low %vm1950_vm1, %vm1949_vm0  ;;  %vm1825_vm11 = vcmp.eq.s32.totalorder %v3772_v1, %v4325_v26  ;;  %vm1822_vm0 = vcmp.eq.s32.totalorder %v3763_v62, %v4325_v26  ;;  %vm1823_vm1 = vcmp.eq.s32.totalorder %v4851_v44, %v4325_v26 }
 0x340   : > { %3184 = vmatprep.subr.msk.bf16.mxu0 %vm4384_vm13, %v3501_v52  ;;  %vm2680_vm4 = vmpackc.low %vm1827_vm5, %vm1826_vm3 }
 0x341   : > { %vm4428_vm8 = vmpackc.low %vm1948_vm7, %vm1947_vm6  ;;  %vm1820_vm6 = vcmp.eq.s32.totalorder %v3757_v60, %v4325_v26  ;;  %vm1821_vm7 = vcmp.eq.s32.totalorder %v4856_v46, %v4325_v26 }
 0x342   : > { %3165 = vmatpush3.bf16.msk.msra.mxu1 %vm4380_vm12, %v3501_v52  ;;  %vm1945_vm12 = vcmp.eq.s32.totalorder %v3769_v0, %v4330_v27  ;;  %vm4448_vm14 = vmpackc.low %vm1825_vm11, %vm1824_vm9 }
 0x343   : > { %3185 = vmatpush3.bf16.msk.msra.mxu0 %vm4384_vm13, %v3501_v52  ;;  %3166 = vmatprep.subr.msk.bf16.mxu1 %vm2678_vm2, %v3501_v52  ;;  %vm1946_vm13 = vcmp.eq.s32.totalorder %v3772_v1, %v4330_v27  ;;  %vm4476_vm3 = vmpackc.low %vm1823_vm1, %vm1822_vm0 }
 0x344   : > { %3186 = vmatprep.subr.msk.bf16.mxu0 %vm4406_vm10, %v3501_v52  ;;  %vm4452_vm15 = vmpackc.low %vm1946_vm13, %vm1945_vm12  ;;  %vm2068_vm12 = vcmp.eq.s32.totalorder %v3799_v10, %v4489_v47  ;;  %vm2069_vm13 = vcmp.eq.s32.totalorder %v3802_v11, %v4489_v47 }
 0x345   : > { %vm2686_vm9 = vmpackc.low %vm1821_vm7, %vm1820_vm6 }
 0x346   : > { %3167 = vmatpush3.bf16.msk.msra.mxu1 %vm2678_vm2, %v3501_v52  ;;  %vm1943_vm2 = vcmp.eq.s32.totalorder %v3763_v62, %v4330_v27  ;;  %vm4532_vm0 = vmpackc.low %vm2069_vm13, %vm2068_vm12 }
 0x347   : > { %3187 = vmatpush3.bf16.msk.msra.mxu0 %vm4406_vm10, %v3501_v52  ;;  %3168 = vmatprep.subr.msk.bf16.mxu1 %vm2680_vm4, %v3501_v52  ;;  %vm1944_vm10 = vcmp.eq.s32.totalorder %v4851_v44, %v4330_v27 }
 0x348   : > { %3188 = vmatprep.subr.msk.bf16.mxu0 %vm4428_vm8, %v3501_v52  ;;  %vm4480_vm5 = vmpackc.low %vm1944_vm10, %vm1943_vm2  ;;  %vm2066_vm2 = vcmp.eq.s32.totalorder %v3793_v8, %v4489_v47  ;;  %vm2067_vm10 = vcmp.eq.s32.totalorder %v3796_v9, %v4489_v47 }
 0x349   : > { %vm4560_vm6 = vmpackc.low %vm2067_vm10, %vm2066_vm2 }
 0x34a   : > { %3169 = vmatpush3.bf16.msk.msra.mxu1 %vm2680_vm4, %v3501_v52  ;;  %vm1941_vm4 = vcmp.eq.s32.totalorder %v3757_v60, %v4330_v27 }
 0x34b   : > { %3189 = vmatpush3.bf16.msk.msra.mxu0 %vm4428_vm8, %v3501_v52  ;;  %3170 = vmatprep.subr.msk.bf16.mxu1 %vm4448_vm14, %v3501_v52  ;;  %vm1942_vm8 = vcmp.eq.s32.totalorder %v4856_v46, %v4330_v27 }
 0x34c   : > { %3190 = vmatprep.subr.msk.bf16.mxu0 %vm4452_vm15, %v3501_v52  ;;  %vm4510_vm11 = vmpackc.low %vm1942_vm8, %vm1941_vm4  ;;  %vm2064_vm4 = vcmp.eq.s32.totalorder %v3787_v6, %v4489_v47  ;;  %vm2065_vm8 = vcmp.eq.s32.totalorder %v3790_v7, %v4489_v47 }
 0x34d   : > { %vm4590_vm12 = vmpackc.low %vm2065_vm8, %vm2064_vm4 }
 0x34e   : > { %3171 = vmatpush3.bf16.msk.msra.mxu1 %vm4448_vm14, %v3501_v52  ;;  %vm2181_vm14 = vcmp.eq.s32.totalorder %v3799_v10, %v4499_v48 }
 0x34f   : > { %3191 = vmatpush3.bf16.msk.msra.mxu0 %vm4452_vm15, %v3501_v52  ;;  %3172 = vmatprep.subr.msk.bf16.mxu1 %vm4476_vm3, %v3501_v52  ;;  %vm2182_vm15 = vcmp.eq.s32.totalorder %v3802_v11, %v4499_v48 }
 0x350   : > { %3192 = vmatprep.subr.msk.bf16.mxu0 %vm4480_vm5, %v3501_v52  ;;  %vm4538_vm1 = vmpackc.low %vm2182_vm15, %vm2181_vm14  ;;  %vm2062_vm14 = vcmp.eq.s32.totalorder %v3781_v4, %v4489_v47  ;;  %vm2063_vm15 = vcmp.eq.s32.totalorder %v3784_v5, %v4489_v47 }
 0x351   : > { %vm2742_vm2 = vmpackc.low %vm2063_vm15, %vm2062_vm14 }
 0x352   : > { %3173 = vmatpush3.bf16.msk.msra.mxu1 %vm4476_vm3, %v3501_v52  ;;  %vm2179_vm3 = vcmp.eq.s32.totalorder %v3793_v8, %v4499_v48 }
 0x353   : > { %3193 = vmatpush3.bf16.msk.msra.mxu0 %vm4480_vm5, %v3501_v52  ;;  %3174 = vmatprep.subr.msk.bf16.mxu1 %vm2686_vm9, %v3501_v52  ;;  %vm2180_vm5 = vcmp.eq.s32.totalorder %v3796_v9, %v4499_v48 }
 0x354   : > { %3194 = vmatprep.subr.msk.bf16.mxu0 %vm4510_vm11, %v3501_v52  ;;  %vm4565_vm7 = vmpackc.low %vm2180_vm5, %vm2179_vm3  ;;  %vm2060_vm3 = vcmp.eq.s32.totalorder %v3775_v2, %v4489_v47  ;;  %vm2061_vm5 = vcmp.eq.s32.totalorder %v3778_v3, %v4489_v47 }
 0x355   : > { %vm2744_vm4 = vmpackc.low %vm2061_vm5, %vm2060_vm3 }
 0x356   : > { %3175 = vmatpush3.bf16.msk.msra.mxu1 %vm2686_vm9, %v3501_v52  ;;  %vm2177_vm9 = vcmp.eq.s32.totalorder %v3787_v6, %v4499_v48 }
 0x357   : > { %3195 = vmatpush3.bf16.msk.msra.mxu0 %vm4510_vm11, %v3501_v52  ;;  %3200 = vmatprep.subr.msk.bf16.mxu1 %vm4532_vm0, %v3501_v52  ;;  %vm2178_vm11 = vcmp.eq.s32.totalorder %v3790_v7, %v4499_v48 }
 0x358   : > { %3220 = vmatprep.subr.msk.bf16.mxu0 %vm4538_vm1, %v3501_v52  ;;  %vm4595_vm13 = vmpackc.low %vm2178_vm11, %vm2177_vm9  ;;  %vm2058_vm9 = vcmp.eq.s32.totalorder %v3769_v0, %v4489_v47  ;;  %vm2059_vm11 = vcmp.eq.s32.totalorder %v3772_v1, %v4489_v47 }
 0x359   : > { %3177 = vmatmul.mubr.bf16.vlgmr.msra.gmra.mxu1 %v4536_v49  ;;  %vm2746_vm14 = vmpackc.low %vm2059_vm11, %vm2058_vm9 }
 0x35a   : > { %3197 = vmatmul.mubr.bf16.vlgmr.msra.gmra.mxu0 %v4536_v49  ;;  %3201 = vmatpush3.bf16.msk.msra.mxu1 %vm4532_vm0, %v3501_v52  ;;  %vm2175_vm0 = vcmp.eq.s32.totalorder %v3781_v4, %v4499_v48 }
 0x35b   : > { %3221 = vmatpush3.bf16.msk.msra.mxu0 %vm4538_vm1, %v3501_v52  ;;  %3202 = vmatprep.subr.msk.bf16.mxu1 %vm4560_vm6, %v3501_v52  ;;  %vm2176_vm1 = vcmp.eq.s32.totalorder %v3784_v5, %v4499_v48 }
 0x35c   : > { %3222 = vmatprep.subr.msk.bf16.mxu0 %vm4565_vm7, %v3501_v52  ;;  %3216 = vmatprep.mubr.bf16.mxu1 %v4327_v24  ;;  %vm4620_vm10 = vmpackc.low %vm2176_vm1, %vm2175_vm0  ;;  %vm2056_vm0 = vcmp.eq.s32.totalorder %v3763_v62, %v4489_v47  ;;  %vm2057_vm1 = vcmp.eq.s32.totalorder %v4851_v44, %v4489_v47 }
 0x35d   : > { %3236 = vmatprep.mubr.bf16.mxu0 %v4327_v24  ;;  %vm2748_vm3 = vmpackc.low %vm2057_vm1, %vm2056_vm0 }
 0x35e   : > { %3203 = vmatpush3.bf16.msk.msra.mxu1 %vm4560_vm6, %v3501_v52  ;;  %vm2173_vm6 = vcmp.eq.s32.totalorder %v3775_v2, %v4499_v48 }
 0x35f   : > { %3223 = vmatpush3.bf16.msk.msra.mxu0 %vm4565_vm7, %v3501_v52  ;;  %3204 = vmatprep.subr.msk.bf16.mxu1 %vm4590_vm12, %v3501_v52  ;;  %vm2174_vm7 = vcmp.eq.s32.totalorder %v3778_v3, %v4499_v48 }
 0x360   : > { %3224 = vmatprep.subr.msk.bf16.mxu0 %vm4595_vm13, %v3501_v52  ;;  %vm4642_vm8 = vmpackc.low %vm2174_vm7, %vm2173_vm6  ;;  %vm2054_vm6 = vcmp.eq.s32.totalorder %v3757_v60, %v4489_v47  ;;  %vm2055_vm7 = vcmp.eq.s32.totalorder %v4856_v46, %v4489_v47 }
 0x361   : > { %vm2750_vm9 = vmpackc.low %vm2055_vm7, %vm2054_vm6 }
 0x362   : > { %3205 = vmatpush3.bf16.msk.msra.mxu1 %vm4590_vm12, %v3501_v52  ;;  %vm2171_vm12 = vcmp.eq.s32.totalorder %v3769_v0, %v4499_v48 }
 0x363   : > { %3225 = vmatpush3.bf16.msk.msra.mxu0 %vm4595_vm13, %v3501_v52  ;;  %3206 = vmatprep.subr.msk.bf16.mxu1 %vm2742_vm2, %v3501_v52  ;;  %vm2172_vm13 = vcmp.eq.s32.totalorder %v3772_v1, %v4499_v48 }
 0x364   : > { %3226 = vmatprep.subr.msk.bf16.mxu0 %vm4620_vm10, %v3501_v52  ;;  %vm4662_vm15 = vmpackc.low %vm2172_vm13, %vm2171_vm12 }
 0x366   : > { %3207 = vmatpush3.bf16.msk.msra.mxu1 %vm2742_vm2, %v3501_v52  ;;  %vm2169_vm2 = vcmp.eq.s32.totalorder %v3763_v62, %v4499_v48 }
 0x367   : > { %3227 = vmatpush3.bf16.msk.msra.mxu0 %vm4620_vm10, %v3501_v52  ;;  %3208 = vmatprep.subr.msk.bf16.mxu1 %vm2744_vm4, %v3501_v52  ;;  %vm2170_vm10 = vcmp.eq.s32.totalorder %v4851_v44, %v4499_v48  ;;  %v2286_v44 = vld [vmem:[#allocation4] sm:$0xff] }
 0x368   : > { %3228 = vmatprep.subr.msk.bf16.mxu0 %vm4642_vm8, %v3501_v52  ;;  %vm2780_vm5 = vmpackc.low %vm2170_vm10, %vm2169_vm2  ;;  %v2290_v47 = vsub.f32 1.0, %v2286_v44 }
 0x36a   : > { %3209 = vmatpush3.bf16.msk.msra.mxu1 %vm2744_vm4, %v3501_v52  ;;  %vm2167_vm4 = vcmp.eq.s32.totalorder %v3757_v60, %v4499_v48  ;;  %v2294_v58 = vmul.f32 %v2290_v47, %v3749_v57 }
 0x36b   : > { %3229 = vmatpush3.bf16.msk.msra.mxu0 %vm4642_vm8, %v3501_v52  ;;  %3210 = vmatprep.subr.msk.bf16.mxu1 %vm2746_vm14, %v3501_v52  ;;  %vm2168_vm8 = vcmp.eq.s32.totalorder %v4856_v46, %v4499_v48  ;;  %v2293_v46 = vmul.f32 %v2289_v43, %v3746_v56 }
 0x36c   : > { %3230 = vmatprep.subr.msk.bf16.mxu0 %vm4662_vm15, %v3501_v52  ;;  %vm2782_vm11 = vmpackc.low %vm2168_vm8, %vm2167_vm4 }
 0x36e   : > { %3211 = vmatpush3.bf16.msk.msra.mxu1 %vm2746_vm14, %v3501_v52 }
 0x36f   : > { %3231 = vmatpush3.bf16.msk.msra.mxu0 %vm4662_vm15, %v3501_v52  ;;  %3212 = vmatprep.subr.msk.bf16.mxu1 %vm2748_vm3, %v3501_v52 }
 0x370   : > { %3232 = vmatprep.subr.msk.bf16.mxu0 %vm2780_vm5, %v3501_v52 }
 0x372   : > { %3213 = vmatpush3.bf16.msk.msra.mxu1 %vm2748_vm3, %v3501_v52 }
 0x373   : > { %3233 = vmatpush3.bf16.msk.msra.mxu0 %vm2780_vm5, %v3501_v52  ;;  %3214 = vmatprep.subr.msk.bf16.mxu1 %vm2750_vm9, %v3501_v52 }
 0x374   : > { %3234 = vmatprep.subr.msk.bf16.mxu0 %vm2782_vm11, %v3501_v52 }
 0x376   : > { %3215 = vmatpush3.bf16.msk.msra.mxu1 %vm2750_vm9, %v3501_v52 }
 0x377   : > { %3235 = vmatpush3.bf16.msk.msra.mxu0 %vm2782_vm11, %v3501_v52 }
 0x379   : > { %3217 = vmatmul.mubr.bf16.vlgmr.msra.gmra.mxu1 %v4536_v49 }
 0x37a   : > { %3237 = vmatmul.mubr.bf16.vlgmr.msra.gmra.mxu0 %v4536_v49  ;;  %v2296_v49 = vmul.f32 %v2292_v32, %v3755_v59 }
 0x3f6   : > { %v3156_v60 = vpop.f32.mrf.mxu0 }
 0x3f8   : > { %v1793_v62 = vpop.f32.mrf.mxu0 }
 0x3fc   : > { %v3159_v0 = vpop.f32.mrf.mxu0 }
 0x3fe   : > { %v1803_v1 = vpop.f32.mrf.mxu0 }
 0x419   : > { %v3178_v3 = vpop.f32.mrf.mxu1 }
 0x41a   : > { %v3198_v5 = vpop.f32.mrf.mxu0 }
 0x41b   : > { %v1922_v50 = vpop.f32.mrf.mxu1  ;;  %v2048_v61 = vmax.f32 %v3178_v3, %v3198_v5 }
 0x41c   : > { %v2031_v34 = vpop.f32.mrf.mxu0 }
 0x41d   : > { %v3179_v35 = vpop.f32.mrf.mxu1  ;;  %v2046_v38 = vmax.f32 %v1922_v50, %v2031_v34 }
 0x41e   : > { %v3199_v36 = vpop.f32.mrf.mxu0 }
 0x41f   : > { %v1925_v37 = vpop.f32.mrf.mxu1  ;;  %v2049_v12 = vmax.f32 %v3179_v35, %v3199_v36 }
 0x420   : > { %v2034_v63 = vpop.f32.mrf.mxu0 }
 0x421   : > { %v2047_v15 = vmax.f32 %v1925_v37, %v2034_v63 }
 0x439   : > { %v3218_v20 = vpop.f32.mrf.mxu1 }
 0x43a   : > { %v2161_v39 = vmax.f32 %v2048_v61, %v3218_v20  ;;  %v3238_v54 = vpop.f32.mrf.mxu0 }
 0x43b   : > { %v2144_v18 = vpop.f32.mrf.mxu1 }
 0x43c   : > { %v2274_v40 = vmax.f32 %v2161_v39, %v3238_v54  ;;  %v2159_v42 = vmax.f32 %v2046_v38, %v2144_v18  ;;  %v2257_v13 = vpop.f32.mrf.mxu0 }
 0x43d   : > { %v3219_v14 = vpop.f32.mrf.mxu1 }
 0x43e   : > { %v2278_v25 = vsub.f32 %v2274_v40, %v1803_v1  ;;  %v2272_v16 = vmax.f32 %v2159_v42, %v2257_v13  ;;  %v2162_v55 = vmax.f32 %v2049_v12, %v3219_v14  ;;  %v3239_v23 = vpop.f32.mrf.mxu0 }
 0x43f   : > { %v2147_v53 = vpop.f32.mrf.mxu1 }
 0x440   : > { %3363 = vtanh.f32 %v2278_v25  ;;  %v2276_v17 = vsub.f32 %v2272_v16, %v1793_v62  ;;  %v2275_v26 = vmax.f32 %v2162_v55, %v3239_v23  ;;  %v2160_v24 = vmax.f32 %v2047_v15, %v2147_v53  ;;  %v2260_v27 = vpop.f32.mrf.mxu0 }
 0x442   : > { %3365 = vtanh.f32 %v2276_v17  ;;  %v2279_v52 = vsub.f32 %v2275_v26, %v3159_v0  ;;  %v2273_v28 = vmax.f32 %v2160_v24, %v2260_v27 }
 0x444   : > { %3367 = vtanh.f32 %v2279_v52  ;;  %v2277_v29 = vsub.f32 %v2273_v28, %v3156_v60 }
 0x446   : > { %3369 = vtanh.f32 %v2277_v29 }
 0x44d   : > { %v3364_v21 = vpop.eup %3363 }
 0x44e   : > { %v2299_v33 = vmul.f32 %v3364_v21, %v2287_v22 }
 0x44f   : > { %v3366_v48 = vpop.eup %3365 }
 0x450   : > { %v2303_v19 = vadd.f32 %v2299_v33, %v2295_v45  ;;  %v2297_v51 = vmul.f32 %v3366_v48, %v2285_v41 }
 0x451   : > { %v3368_v10 = vpop.eup %3367 }
 0x452   : > { %2307 = vst [vmem:[%s3660_s11 + $0x10] sm:$0xff] %v2303_v19  ;;  %v2301_v11 = vadd.f32 %v2297_v51, %v2293_v46  ;;  %v2300_v8 = vmul.f32 %v3368_v10, %v2288_v31 }
 0x453   : > { %v3370_v9 = vpop.eup %3369 }
 0x454   : > { %2305 = vst [vmem:[%s3660_s11] sm:$0xff] %v2301_v11  ;;  %v2304_v6 = vadd.f32 %v2300_v8, %v2296_v49  ;;  %v2298_v7 = vmul.f32 %v3370_v9, %v2286_v44 }
 0x456   : > { %2308 = vst [vmem:[%s3660_s11 + $0x18] sm:$0xff] %v2304_v6  ;;  %v2302_v4 = vadd.f32 %v2298_v7, %v2294_v58 }
 0x458   : > { %2306 = vst [vmem:[%s3660_s11 + $0x8] sm:$0xff] %v2302_v4 }
 0x459 PF: > { %s2803_s13 = sshll.u32 %s3483_s25, 9  ;;  %s2325_s18 = sshll.u32 %s3660_s11, 4  ;;  %s4719_s18 = int_to_ptr.vmem [resolvable:$true] %s2325_s18 }
 0x45a   : > { %s4716_s10 = scalar_lea.hbm %s4778_s6, %s2803_s13  ;;  %s2310_s20 = scalar_lea.sflag [#allocation7], %s3637_s27 }
 0x45b   : > { %s3399_s7 = scalar_lea.vmem %s4719_s18, 512  ;;  %s3502_s8 = smov [#allocation8]  }
 0x45c   : > { %p3400_p5 = scmp.ne.s32.totalorder %s4719_s18, %s3399_s7  ;;  %s3403_s29 = sshll.u32 %s3502_s8, 4  ;;  %s3404_s29 = int_to_ptr.vmem [resolvable:$false] %s3403_s29 }
 0x45d   : > { %s3405_s25 = scalar_lea.vmem %s3404_s29, 1024  ;;  %p3406_p8 = scmp.lt.s32.totalorder %s4719_s18, %s3404_s29 }
 0x45e   : > { %p3401_p6 = pnand %p3400_p5, %p3603_p10  ;;  %p3407_p12 = scmp.lt.s32.totalorder %s3405_s25, %s3399_s7 }
 0x460   : > { %p3402_p7 = pneg %p3401_p6  ;;  %p3408_p3 = por %p3407_p12, %p3406_p8 }
 0x462   : > { %p3409_p13 = pnand %p3408_p3, %p3402_p7 }
 0x464   : > { %3412 = shalt.err (!%p3409_p13)
}
 0x465   : > { %s3413_s11 = scalar_lea.hbm %s4716_s10, 512  ;;  %s3417_s19 = scalar_lea.hbm %s4778_s6, 1024 }
 0x466   : > { %p3414_p2 = scmp.ne.s32.totalorder %s4716_s10, %s3413_s11  ;;  %p3418_p9 = scmp.lt.s32.totalorder %s4716_s10, %s4778_s6 }
 0x467   : > { %p3419_p4 = scmp.lt.s32.totalorder %s3417_s19, %s3413_s11 }
 0x468   : > { %p3415_p0 = pnand %p3414_p2, %p3603_p10 }
 0x469   : > { %p3420_p5 = por %p3419_p4, %p3418_p9 }
 0x46a   : > { %p3416_p1 = pneg %p3415_p0 }
 0x46c   : > { %p3421_p6 = pnand %p3420_p5, %p3416_p1 }
 0x46e   : > { %3424 = shalt.err (!%p3421_p6)
}
 0x46f   : > { %s3503_s9 = smov 128   ;;  %s3504_s17 = smov 8  }
 0x470   : > { %3243 = dma.vmem_to_hbm [thread:$0]  (%p3603_p10), %s4719_s18, 512, %s4716_s10, %s2310_s20, %s3503_s9, %s3503_s9, %s3504_s17  }
 0x471 PF: > { %p3254_p7 = scmp.ge.s32.totalorder %s3495_s28, 2  ;;  %s2340_s7 = sand.u32 1, %s3467_s21  }
 0x472   : > { %s2341_s8 = scalar_lea.sflag [#allocation7], %s2340_s7 }
 0x473   : > { %p3250_p8 = pnand %p3254_p7, %p3609_p11 }
 0x475   : > { %p3251_p12 = pneg %p3250_p8 }
 0x477   : > { %3462 = dma.done.wait (%p3251_p12), %s2341_s8, 512  }
 0x478   : > { %3464 = vsyncadd (%p3251_p12), %s2341_s8, 4294966784  ;;  %s22_s28 = sadd.s32 1, %s3495_s28   ;;  %s4877_s25 = sld [smem:[#allocation11_spill]] }
 0x479   : > { %p19_p3 = scmp.ge.s32.totalorder %s22_s28, 6   ;;  %s4878_s12 = sld [smem:[#allocation12_spill]] }
 0x47a   : > { %s4879_s27 = sld [smem:[#allocation13_spill]]  ;;  %s4880_s21 = smov %s3471_s22 }
 0x47b   : > { %s4881_s22 = smov %s3475_s23  ;;  %s4882_s23 = smov %s3616_s16 }
 0x47c   : > { %s4883_s24 = smov %s3487_s26  ;;  %21 = sbr.rel (!%p19_p3) target bundleno = 7 (0x7), region = 112 }
 0x47f   : > { %s4884_s26 = smov %s4878_s12 }
 0x481   :  { %2346 = vsyncpa [#allocation6], 1 }
 0x482   :  { %2348 = vsyncpa [#allocation6 + $0x1], 1 }
 0x483   :  { %2349 = vsyncpa [#allocation7], 1 }
 0x484   :  { %2351 = vsyncpa [#allocation7 + $0x1], 1 }

</bundles_post_ra>
